<compile_context>
chip_gen: v5e
topology: v5e:2x2
jax: 0.10.0
libtpu: 0.0.40
codegen_flags: <defaults>
</compile_context>

<pallas_src>
import numpy as np
import jax
import jax.numpy as jnp
from jax.experimental import pallas as pl
from jax.experimental.pallas import tpu as pltpu

# ---- small hyper-params consistent with DecoderRNN.__init__ ----
EMBED = 32        # embed_size
HIDDEN = 32       # hidden_size
VOCAB = 48        # vocab_size
NUM_LAYERS = 2    # num_layers
BATCH = 4
CAP_LEN = 7       # caption token length
SEQ = CAP_LEN + 1 # features.unsqueeze(1) is prepended as step 0

BATCH_PAD = 8     # pad batch to the 8-sublane quantum
VOCAB_PAD = 128   # pad vocab to the 128-lane quantum (lane-dense output)


# --------------------------- fused decoder kernel ---------------------------
def make_decoder_kernel(T, B, H, num_layers, vpad):
    """One invocation: unrolled multi-layer LSTM over T steps + fused head."""
    G = 4 * H  # 128 lanes: i | f | g | o

    def kernel(x_ref, wih0_ref, whh0_ref, b0_ref, *refs):
        # refs = [wcat_1, b_1, ..., wcat_{L-1}, b_{L-1}, wlin, blin, out_ref]
        layer_refs = refs[:2 * (num_layers - 1)]
        wlin_ref, blin_ref, out_ref = refs[2 * (num_layers - 1):]

        # Hoist broadcasts out of the unrolled loop (JAX doesn't CSE them).
        b_bc = [jnp.broadcast_to(layer_refs[2 * (l - 1) + 1][...], (B, G))
                for l in range(1, num_layers)]
        blin_bc = jnp.broadcast_to(blin_ref[...], (B, vpad))

        # Layer-0 input projection hoisted off the serial chain:
        # one well-shaped [T*B, E] @ [E, 4H] MXU pass, bias folded in.
        ih0_all = (jnp.dot(x_ref[...], wih0_ref[...],
                           preferred_element_type=jnp.float32)
                   + jnp.broadcast_to(b0_ref[...], (T * B, G)))

        whh0 = whh0_ref[...]
        wcat = [layer_refs[2 * (l - 1)][...] for l in range(1, num_layers)]
        wlin = wlin_ref[...]

        h = [jnp.zeros((B, H), jnp.float32) for _ in range(num_layers)]
        c = [jnp.zeros((B, H), jnp.float32) for _ in range(num_layers)]

        def cell(gates, c_prev):
            # gates: [B, 4H] lane-packed as i|f|g|o; one full-vreg sigmoid,
            # then static lane slices (VPU/XLU, off the EUP path).
            sig = jax.nn.sigmoid(gates)
            i_g = sig[:, 0 * H:1 * H]
            f_g = sig[:, 1 * H:2 * H]
            o_g = sig[:, 3 * H:4 * H]
            g_g = jnp.tanh(gates[:, 2 * H:3 * H])
            c_new = f_g * c_prev + i_g * g_g
            h_new = o_g * jnp.tanh(c_new)
            return h_new, c_new

        # Fully-unrolled static time loop; all slices/stores are static.
        for t in range(T):
            # layer 0: only the recurrent matmul stays on the serial chain
            gates0 = ih0_all[t * B:(t + 1) * B, :] + jnp.dot(
                h[0], whh0, preferred_element_type=jnp.float32)
            h[0], c[0] = cell(gates0, c[0])
            inp = h[0]
            # layers >= 1: one matmul per cell over the concatenated input
            for l in range(1, num_layers):
                xin = jnp.concatenate([inp, h[l]], axis=1)        # [B, 2H]
                gates = jnp.dot(xin, wcat[l - 1],
                                preferred_element_type=jnp.float32) + b_bc[l - 1]
                h[l], c[l] = cell(gates, c[l])
                inp = h[l]
            # fused head: lane-dense (128-wide) per-step store, no scratch slab
            out_ref[t * B:(t + 1) * B, :] = (
                jnp.dot(inp, wlin, preferred_element_type=jnp.float32) + blin_bc)

    return kernel


def run_decoder(x_flat, wih0, whh0, b0, upper_layers, wlin_p, blin_p):
    """x_flat: [T*Bp, E]; layer 0 weights lane-packed [E,4H]/[H,4H]/[1,4H];
    upper_layers: per layer ( [2H,4H], [1,4H] ); head [H,Vp]/[1,Vp].
    Returns logits [T*Bp, Vp]."""
    TB, E = x_flat.shape
    T = TB // BATCH_PAD
    kernel = make_decoder_kernel(T, BATCH_PAD, HIDDEN, NUM_LAYERS, VOCAB_PAD)

    extra = []
    for (wcat, b) in upper_layers:
        extra += [wcat, b]

    G = 4 * HIDDEN
    flops = (2 * TB * E * G                                   # hoisted ih0
             + T * 2 * BATCH_PAD * HIDDEN * G                 # per-step hh0
             + T * (NUM_LAYERS - 1) * 2 * BATCH_PAD * 2 * HIDDEN * G  # upper
             + T * 2 * BATCH_PAD * HIDDEN * VOCAB_PAD)        # head
    transcend = T * NUM_LAYERS * BATCH_PAD * (G + 2 * HIDDEN)
    bytes_acc = 4 * (x_flat.size + wih0.size + whh0.size + b0.size
                     + sum(w.size + b.size for (w, b) in upper_layers)
                     + wlin_p.size + blin_p.size + TB * VOCAB_PAD)

    return pl.pallas_call(
        kernel,
        out_shape=jax.ShapeDtypeStruct((TB, VOCAB_PAD), jnp.float32),
        cost_estimate=pl.CostEstimate(flops=flops,
                                      transcendentals=transcend,
                                      bytes_accessed=bytes_acc),
    )(x_flat, wih0, whh0, b0, *extra, wlin_p, blin_p)


# --------------------------- DecoderRNN.forward ---------------------------
def decoder_forward(features, captions, lengths, embed_tbl, lstm_params, lin_w, lin_b):
    # embeddings = self.embed(captions)   (gather = plain-JAX glue)
    emb = embed_tbl[captions]                                   # [B, Tc, E]
    # torch.cat((features.unsqueeze(1), embeddings), 1)
    x = jnp.concatenate([features[:, None, :], emb], axis=1)    # [B, T, E]
    B, T, E = x.shape
    x_tbe = jnp.transpose(x, (1, 0, 2)).astype(jnp.float32)     # [T, B, E]
    # pad batch to the full sublane quantum (zero rows, never selected later)
    x_tbe = jnp.pad(x_tbe, ((0, 0), (0, BATCH_PAD - B), (0, 0)))
    x_flat = x_tbe.reshape(T * BATCH_PAD, E)                    # [T*Bp, E]

    # LSTM weights are already lane-packed [in, 4H] with gate order i|f|g|o.
    wih0, whh0, b0 = lstm_params[0]
    upper_layers = []
    for l in range(1, NUM_LAYERS):
        wih, whh, b = lstm_params[l]
        upper_layers.append((jnp.concatenate([wih, whh], axis=0), b))  # [2H,4H]

    # pad the linear head to a lane-dense (128-wide) output
    wlin_p = jnp.pad(lin_w, ((0, 0), (0, VOCAB_PAD - VOCAB)))
    blin_p = jnp.pad(lin_b, ((0, 0), (0, VOCAB_PAD - VOCAB)))

    logits = run_decoder(x_flat, wih0, whh0, b0, upper_layers, wlin_p, blin_p)

    # pack_padded_sequence(batch_first=True) data ordering (lengths sorted desc):
    # for t: for b with lengths[b] > t: emit row (b, t).
    # TODO(synk): lengths must be a static Python list here; a traced lengths
    # array would need an in-kernel masked/packed write instead.
    packed_idx = []
    for t in range(T):
        for b in range(B):
            if lengths[b] > t:
                packed_idx.append(t * BATCH_PAD + b)
    packed_idx = jnp.asarray(np.array(packed_idx, dtype=np.int32))

    # outputs = self.linear(hiddens[0]); drop batch/vocab padding
    return logits[packed_idx, :VOCAB]                           # [N, V]


# --------------------------- pure-JAX reference ---------------------------
def reference_forward(features, captions, lengths, embed_tbl, lstm_params, lin_w, lin_b):
    emb = embed_tbl[captions]
    x = jnp.concatenate([features[:, None, :], emb], axis=1)
    B, T, _ = x.shape
    h = [jnp.zeros((B, HIDDEN), jnp.float32) for _ in range(NUM_LAYERS)]
    c = [jnp.zeros((B, HIDDEN), jnp.float32) for _ in range(NUM_LAYERS)]
    outs = []
    for t in range(T):
        inp = x[:, t, :]
        for l, (wih, whh, b) in enumerate(lstm_params):
            gates = inp @ wih + h[l] @ whh + b
            i = jax.nn.sigmoid(gates[:, :HIDDEN])
            f = jax.nn.sigmoid(gates[:, HIDDEN:2 * HIDDEN])
            g = jnp.tanh(gates[:, 2 * HIDDEN:3 * HIDDEN])
            o = jax.nn.sigmoid(gates[:, 3 * HIDDEN:])
            c[l] = f * c[l] + i * g
            h[l] = o * jnp.tanh(c[l])
            inp = h[l]
        outs.append(inp)
    hiddens = jnp.stack(outs, axis=1)                           # [B, T, H]
    packed = []
    for t in range(T):
        for b in range(B):
            if lengths[b] > t:
                packed.append(hiddens[b, t])
    packed = jnp.stack(packed, 0)
    return packed @ lin_w + lin_b


# --------------------------- main ---------------------------
if __name__ == "__main__":
    key = jax.random.PRNGKey(0)
    ks = jax.random.split(key, 4 + 3 * NUM_LAYERS + 2)

    # deterministic synthetic parameters (shapes from DecoderRNN.__init__),
    # already in the packed [in, 4H] layout with gate order i|f|g|o.
    embed_tbl = 0.1 * jax.random.normal(ks[0], (VOCAB, EMBED), jnp.float32)
    lstm_params = []
    for l in range(NUM_LAYERS):
        in_dim = EMBED if l == 0 else HIDDEN
        wih = 0.1 * jax.random.normal(ks[1 + 3 * l], (in_dim, 4 * HIDDEN), jnp.float32)
        whh = 0.1 * jax.random.normal(ks[2 + 3 * l], (HIDDEN, 4 * HIDDEN), jnp.float32)
        bb = 0.1 * jax.random.normal(ks[3 + 3 * l], (1, 4 * HIDDEN), jnp.float32)
        lstm_params.append((wih, whh, bb))
    lin_w = 0.1 * jax.random.normal(ks[-3], (HIDDEN, VOCAB), jnp.float32)  # W^T layout
    lin_b = 0.1 * jax.random.normal(ks[-2], (1, VOCAB), jnp.float32)

    # example inputs
    features = jax.random.normal(ks[-1], (BATCH, EMBED), jnp.float32)
    captions = jax.random.randint(jax.random.PRNGKey(42), (BATCH, CAP_LEN), 0, VOCAB)
    lengths = [SEQ, 6, 5, 3]   # sorted descending, as pack_padded_sequence requires

    out = decoder_forward(features, captions, lengths,
                          embed_tbl, lstm_params, lin_w, lin_b)
    out = jax.block_until_ready(out)

    ref = reference_forward(features, captions, lengths,
                            embed_tbl, lstm_params, lin_w, lin_b)
    np.testing.assert_allclose(np.asarray(out), np.asarray(ref), rtol=2e-3, atol=2e-3)
    assert out.shape == (sum(lengths), VOCAB)

    print("KERNEL_OK")
</pallas_src>

<mosaic_0001>
module attributes {stable_mosaic.version = 11 : i64} {
  func.func @kernel(%arg0: memref<64x32xf32, #tpu.memory_space<vmem>>, %arg1: memref<32x128xf32, #tpu.memory_space<vmem>>, %arg2: memref<32x128xf32, #tpu.memory_space<vmem>>, %arg3: memref<1x128xf32, #tpu.memory_space<vmem>>, %arg4: memref<64x128xf32, #tpu.memory_space<vmem>>, %arg5: memref<1x128xf32, #tpu.memory_space<vmem>>, %arg6: memref<32x128xf32, #tpu.memory_space<vmem>>, %arg7: memref<1x128xf32, #tpu.memory_space<vmem>>, %arg8: memref<64x128xf32, #tpu.memory_space<vmem>>) attributes {dimension_semantics = [], scalar_prefetch = 0 : i64, scratch_operands = 0 : i64, tpu.core_type = #tpu.core_type<tc>} {
    %c0 = arith.constant 0 : index
    %c0_0 = arith.constant 0 : index
    %0 = vector.load %arg5[%c0, %c0_0] : memref<1x128xf32, #tpu.memory_space<vmem>>, vector<1x128xf32>
    %1 = vector.shape_cast %0 : vector<1x128xf32> to vector<1x128xf32>
    %2 = vector.broadcast %1 : vector<1x128xf32> to vector<8x128xf32>
    %c0_1 = arith.constant 0 : index
    %c0_2 = arith.constant 0 : index
    %3 = vector.load %arg7[%c0_1, %c0_2] : memref<1x128xf32, #tpu.memory_space<vmem>>, vector<1x128xf32>
    %4 = vector.shape_cast %3 : vector<1x128xf32> to vector<1x128xf32>
    %5 = vector.broadcast %4 : vector<1x128xf32> to vector<8x128xf32>
    %c0_3 = arith.constant 0 : index
    %c0_4 = arith.constant 0 : index
    %6 = vector.load %arg0[%c0_3, %c0_4] : memref<64x32xf32, #tpu.memory_space<vmem>>, vector<64x32xf32>
    %c0_5 = arith.constant 0 : index
    %c0_6 = arith.constant 0 : index
    %7 = vector.load %arg1[%c0_5, %c0_6] : memref<32x128xf32, #tpu.memory_space<vmem>>, vector<32x128xf32>
    %cst = arith.constant dense<0.000000e+00> : vector<64x128xf32>
    %8 = tpu.matmul %6, %7, %cst {dimension_numbers = #tpu.dot_dimension_numbers<[1], [0], [0], [1], [0, 0, 1, 1], [], []>} : vector<64x32xf32>, vector<32x128xf32>, vector<64x128xf32> -> vector<64x128xf32>
    %c0_7 = arith.constant 0 : index
    %c0_8 = arith.constant 0 : index
    %9 = vector.load %arg3[%c0_7, %c0_8] : memref<1x128xf32, #tpu.memory_space<vmem>>, vector<1x128xf32>
    %10 = vector.shape_cast %9 : vector<1x128xf32> to vector<1x128xf32>
    %11 = vector.broadcast %10 : vector<1x128xf32> to vector<64x128xf32>
    %12 = arith.addf %8, %11 : vector<64x128xf32>
    %c0_9 = arith.constant 0 : index
    %c0_10 = arith.constant 0 : index
    %13 = vector.load %arg2[%c0_9, %c0_10] : memref<32x128xf32, #tpu.memory_space<vmem>>, vector<32x128xf32>
    %c0_11 = arith.constant 0 : index
    %c0_12 = arith.constant 0 : index
    %14 = vector.load %arg4[%c0_11, %c0_12] : memref<64x128xf32, #tpu.memory_space<vmem>>, vector<64x128xf32>
    %c0_13 = arith.constant 0 : index
    %c0_14 = arith.constant 0 : index
    %15 = vector.load %arg6[%c0_13, %c0_14] : memref<32x128xf32, #tpu.memory_space<vmem>>, vector<32x128xf32>
    %cst_15 = arith.constant 0.000000e+00 : f32
    %16 = vector.broadcast %cst_15 : f32 to vector<8x32xf32>
    %cst_16 = arith.constant 0.000000e+00 : f32
    %17 = vector.broadcast %cst_16 : f32 to vector<8x32xf32>
    %cst_17 = arith.constant 0.000000e+00 : f32
    %18 = vector.broadcast %cst_17 : f32 to vector<8x32xf32>
    %cst_18 = arith.constant 0.000000e+00 : f32
    %19 = vector.broadcast %cst_18 : f32 to vector<8x32xf32>
    %20 = vector.extract_strided_slice %12 {offsets = [0, 0], sizes = [8, 128], strides = [1, 1]} : vector<64x128xf32> to vector<8x128xf32>
    %cst_19 = arith.constant dense<0.000000e+00> : vector<8x128xf32>
    %21 = tpu.matmul %16, %13, %cst_19 {dimension_numbers = #tpu.dot_dimension_numbers<[1], [0], [0], [1], [0, 0, 1, 1], [], []>} : vector<8x32xf32>, vector<32x128xf32>, vector<8x128xf32> -> vector<8x128xf32>
    %22 = arith.addf %20, %21 : vector<8x128xf32>
    %23 = arith.negf %22 : vector<8x128xf32>
    %24 = math.exp %23 : vector<8x128xf32>
    %cst_20 = arith.constant 1.000000e+00 : f32
    %25 = vector.broadcast %cst_20 : f32 to vector<8x128xf32>
    %26 = arith.addf %25, %24 : vector<8x128xf32>
    %27 = arith.divf %25, %26 : vector<8x128xf32>
    %28 = vector.extract_strided_slice %27 {offsets = [0, 0], sizes = [8, 32], strides = [1, 1]} : vector<8x128xf32> to vector<8x32xf32>
    %29 = vector.extract_strided_slice %27 {offsets = [0, 32], sizes = [8, 32], strides = [1, 1]} : vector<8x128xf32> to vector<8x32xf32>
    %30 = vector.extract_strided_slice %27 {offsets = [0, 96], sizes = [8, 32], strides = [1, 1]} : vector<8x128xf32> to vector<8x32xf32>
    %31 = vector.extract_strided_slice %22 {offsets = [0, 64], sizes = [8, 32], strides = [1, 1]} : vector<8x128xf32> to vector<8x32xf32>
    %32 = math.tanh %31 : vector<8x32xf32>
    %33 = arith.mulf %29, %18 : vector<8x32xf32>
    %34 = arith.mulf %28, %32 : vector<8x32xf32>
    %35 = arith.addf %33, %34 : vector<8x32xf32>
    %36 = math.tanh %35 : vector<8x32xf32>
    %37 = arith.mulf %30, %36 : vector<8x32xf32>
    %38 = tpu.concatenate %37, %17 in 1 : vector<8x32xf32>, vector<8x32xf32> -> vector<8x64xf32>
    %cst_21 = arith.constant dense<0.000000e+00> : vector<8x128xf32>
    %39 = tpu.matmul %38, %14, %cst_21 {dimension_numbers = #tpu.dot_dimension_numbers<[1], [0], [0], [1], [0, 0, 1, 1], [], []>} : vector<8x64xf32>, vector<64x128xf32>, vector<8x128xf32> -> vector<8x128xf32>
    %40 = arith.addf %39, %2 : vector<8x128xf32>
    %41 = arith.negf %40 : vector<8x128xf32>
    %42 = math.exp %41 : vector<8x128xf32>
    %cst_22 = arith.constant 1.000000e+00 : f32
    %43 = vector.broadcast %cst_22 : f32 to vector<8x128xf32>
    %44 = arith.addf %43, %42 : vector<8x128xf32>
    %45 = arith.divf %43, %44 : vector<8x128xf32>
    %46 = vector.extract_strided_slice %45 {offsets = [0, 0], sizes = [8, 32], strides = [1, 1]} : vector<8x128xf32> to vector<8x32xf32>
    %47 = vector.extract_strided_slice %45 {offsets = [0, 32], sizes = [8, 32], strides = [1, 1]} : vector<8x128xf32> to vector<8x32xf32>
    %48 = vector.extract_strided_slice %45 {offsets = [0, 96], sizes = [8, 32], strides = [1, 1]} : vector<8x128xf32> to vector<8x32xf32>
    %49 = vector.extract_strided_slice %40 {offsets = [0, 64], sizes = [8, 32], strides = [1, 1]} : vector<8x128xf32> to vector<8x32xf32>
    %50 = math.tanh %49 : vector<8x32xf32>
    %51 = arith.mulf %47, %19 : vector<8x32xf32>
    %52 = arith.mulf %46, %50 : vector<8x32xf32>
    %53 = arith.addf %51, %52 : vector<8x32xf32>
    %54 = math.tanh %53 : vector<8x32xf32>
    %55 = arith.mulf %48, %54 : vector<8x32xf32>
    %cst_23 = arith.constant dense<0.000000e+00> : vector<8x128xf32>
    %56 = tpu.matmul %55, %15, %cst_23 {dimension_numbers = #tpu.dot_dimension_numbers<[1], [0], [0], [1], [0, 0, 1, 1], [], []>} : vector<8x32xf32>, vector<32x128xf32>, vector<8x128xf32> -> vector<8x128xf32>
    %57 = arith.addf %56, %5 : vector<8x128xf32>
    %c0_24 = arith.constant 0 : index
    %c0_25 = arith.constant 0 : index
    %58 = vector.load %arg8[%c0_24, %c0_25] : memref<64x128xf32, #tpu.memory_space<vmem>>, vector<8x128xf32>
    tpu.vector_store %arg8[%c0_24, %c0_25], %57 {strides = array<i32>} : memref<64x128xf32, #tpu.memory_space<vmem>>, vector<8x128xf32>,
    %59 = vector.extract_strided_slice %12 {offsets = [8, 0], sizes = [8, 128], strides = [1, 1]} : vector<64x128xf32> to vector<8x128xf32>
    %cst_26 = arith.constant dense<0.000000e+00> : vector<8x128xf32>
    %60 = tpu.matmul %37, %13, %cst_26 {dimension_numbers = #tpu.dot_dimension_numbers<[1], [0], [0], [1], [0, 0, 1, 1], [], []>} : vector<8x32xf32>, vector<32x128xf32>, vector<8x128xf32> -> vector<8x128xf32>
    %61 = arith.addf %59, %60 : vector<8x128xf32>
    %62 = arith.negf %61 : vector<8x128xf32>
    %63 = math.exp %62 : vector<8x128xf32>
    %cst_27 = arith.constant 1.000000e+00 : f32
    %64 = vector.broadcast %cst_27 : f32 to vector<8x128xf32>
    %65 = arith.addf %64, %63 : vector<8x128xf32>
    %66 = arith.divf %64, %65 : vector<8x128xf32>
    %67 = vector.extract_strided_slice %66 {offsets = [0, 0], sizes = [8, 32], strides = [1, 1]} : vector<8x128xf32> to vector<8x32xf32>
    %68 = vector.extract_strided_slice %66 {offsets = [0, 32], sizes = [8, 32], strides = [1, 1]} : vector<8x128xf32> to vector<8x32xf32>
    %69 = vector.extract_strided_slice %66 {offsets = [0, 96], sizes = [8, 32], strides = [1, 1]} : vector<8x128xf32> to vector<8x32xf32>
    %70 = vector.extract_strided_slice %61 {offsets = [0, 64], sizes = [8, 32], strides = [1, 1]} : vector<8x128xf32> to vector<8x32xf32>
    %71 = math.tanh %70 : vector<8x32xf32>
    %72 = arith.mulf %68, %35 : vector<8x32xf32>
    %73 = arith.mulf %67, %71 : vector<8x32xf32>
    %74 = arith.addf %72, %73 : vector<8x32xf32>
    %75 = math.tanh %74 : vector<8x32xf32>
    %76 = arith.mulf %69, %75 : vector<8x32xf32>
    %77 = tpu.concatenate %76, %55 in 1 : vector<8x32xf32>, vector<8x32xf32> -> vector<8x64xf32>
    %cst_28 = arith.constant dense<0.000000e+00> : vector<8x128xf32>
    %78 = tpu.matmul %77, %14, %cst_28 {dimension_numbers = #tpu.dot_dimension_numbers<[1], [0], [0], [1], [0, 0, 1, 1], [], []>} : vector<8x64xf32>, vector<64x128xf32>, vector<8x128xf32> -> vector<8x128xf32>
    %79 = arith.addf %78, %2 : vector<8x128xf32>
    %80 = arith.negf %79 : vector<8x128xf32>
    %81 = math.exp %80 : vector<8x128xf32>
    %cst_29 = arith.constant 1.000000e+00 : f32
    %82 = vector.broadcast %cst_29 : f32 to vector<8x128xf32>
    %83 = arith.addf %82, %81 : vector<8x128xf32>
    %84 = arith.divf %82, %83 : vector<8x128xf32>
    %85 = vector.extract_strided_slice %84 {offsets = [0, 0], sizes = [8, 32], strides = [1, 1]} : vector<8x128xf32> to vector<8x32xf32>
    %86 = vector.extract_strided_slice %84 {offsets = [0, 32], sizes = [8, 32], strides = [1, 1]} : vector<8x128xf32> to vector<8x32xf32>
    %87 = vector.extract_strided_slice %84 {offsets = [0, 96], sizes = [8, 32], strides = [1, 1]} : vector<8x128xf32> to vector<8x32xf32>
    %88 = vector.extract_strided_slice %79 {offsets = [0, 64], sizes = [8, 32], strides = [1, 1]} : vector<8x128xf32> to vector<8x32xf32>
    %89 = math.tanh %88 : vector<8x32xf32>
    %90 = arith.mulf %86, %53 : vector<8x32xf32>
    %91 = arith.mulf %85, %89 : vector<8x32xf32>
    %92 = arith.addf %90, %91 : vector<8x32xf32>
    %93 = math.tanh %92 : vector<8x32xf32>
    %94 = arith.mulf %87, %93 : vector<8x32xf32>
    %cst_30 = arith.constant dense<0.000000e+00> : vector<8x128xf32>
    %95 = tpu.matmul %94, %15, %cst_30 {dimension_numbers = #tpu.dot_dimension_numbers<[1], [0], [0], [1], [0, 0, 1, 1], [], []>} : vector<8x32xf32>, vector<32x128xf32>, vector<8x128xf32> -> vector<8x128xf32>
    %96 = arith.addf %95, %5 : vector<8x128xf32>
    %c8 = arith.constant 8 : index
    %c0_31 = arith.constant 0 : index
    %97 = vector.load %arg8[%c8, %c0_31] : memref<64x128xf32, #tpu.memory_space<vmem>>, vector<8x128xf32>
    tpu.vector_store %arg8[%c8, %c0_31], %96 {strides = array<i32>} : memref<64x128xf32, #tpu.memory_space<vmem>>, vector<8x128xf32>,
    %98 = vector.extract_strided_slice %12 {offsets = [16, 0], sizes = [8, 128], strides = [1, 1]} : vector<64x128xf32> to vector<8x128xf32>
    %cst_32 = arith.constant dense<0.000000e+00> : vector<8x128xf32>
    %99 = tpu.matmul %76, %13, %cst_32 {dimension_numbers = #tpu.dot_dimension_numbers<[1], [0], [0], [1], [0, 0, 1, 1], [], []>} : vector<8x32xf32>, vector<32x128xf32>, vector<8x128xf32> -> vector<8x128xf32>
    %100 = arith.addf %98, %99 : vector<8x128xf32>
    %101 = arith.negf %100 : vector<8x128xf32>
    %102 = math.exp %101 : vector<8x128xf32>
    %cst_33 = arith.constant 1.000000e+00 : f32
    %103 = vector.broadcast %cst_33 : f32 to vector<8x128xf32>
    %104 = arith.addf %103, %102 : vector<8x128xf32>
    %105 = arith.divf %103, %104 : vector<8x128xf32>
    %106 = vector.extract_strided_slice %105 {offsets = [0, 0], sizes = [8, 32], strides = [1, 1]} : vector<8x128xf32> to vector<8x32xf32>
    %107 = vector.extract_strided_slice %105 {offsets = [0, 32], sizes = [8, 32], strides = [1, 1]} : vector<8x128xf32> to vector<8x32xf32>
    %108 = vector.extract_strided_slice %105 {offsets = [0, 96], sizes = [8, 32], strides = [1, 1]} : vector<8x128xf32> to vector<8x32xf32>
    %109 = vector.extract_strided_slice %100 {offsets = [0, 64], sizes = [8, 32], strides = [1, 1]} : vector<8x128xf32> to vector<8x32xf32>
    %110 = math.tanh %109 : vector<8x32xf32>
    %111 = arith.mulf %107, %74 : vector<8x32xf32>
    %112 = arith.mulf %106, %110 : vector<8x32xf32>
    %113 = arith.addf %111, %112 : vector<8x32xf32>
    %114 = math.tanh %113 : vector<8x32xf32>
    %115 = arith.mulf %108, %114 : vector<8x32xf32>
    %116 = tpu.concatenate %115, %94 in 1 : vector<8x32xf32>, vector<8x32xf32> -> vector<8x64xf32>
    %cst_34 = arith.constant dense<0.000000e+00> : vector<8x128xf32>
    %117 = tpu.matmul %116, %14, %cst_34 {dimension_numbers = #tpu.dot_dimension_numbers<[1], [0], [0], [1], [0, 0, 1, 1], [], []>} : vector<8x64xf32>, vector<64x128xf32>, vector<8x128xf32> -> vector<8x128xf32>
    %118 = arith.addf %117, %2 : vector<8x128xf32>
    %119 = arith.negf %118 : vector<8x128xf32>
    %120 = math.exp %119 : vector<8x128xf32>
    %cst_35 = arith.constant 1.000000e+00 : f32
    %121 = vector.broadcast %cst_35 : f32 to vector<8x128xf32>
    %122 = arith.addf %121, %120 : vector<8x128xf32>
    %123 = arith.divf %121, %122 : vector<8x128xf32>
    %124 = vector.extract_strided_slice %123 {offsets = [0, 0], sizes = [8, 32], strides = [1, 1]} : vector<8x128xf32> to vector<8x32xf32>
    %125 = vector.extract_strided_slice %123 {offsets = [0, 32], sizes = [8, 32], strides = [1, 1]} : vector<8x128xf32> to vector<8x32xf32>
    %126 = vector.extract_strided_slice %123 {offsets = [0, 96], sizes = [8, 32], strides = [1, 1]} : vector<8x128xf32> to vector<8x32xf32>
    %127 = vector.extract_strided_slice %118 {offsets = [0, 64], sizes = [8, 32], strides = [1, 1]} : vector<8x128xf32> to vector<8x32xf32>
    %128 = math.tanh %127 : vector<8x32xf32>
    %129 = arith.mulf %125, %92 : vector<8x32xf32>
    %130 = arith.mulf %124, %128 : vector<8x32xf32>
    %131 = arith.addf %129, %130 : vector<8x32xf32>
    %132 = math.tanh %131 : vector<8x32xf32>
    %133 = arith.mulf %126, %132 : vector<8x32xf32>
    %cst_36 = arith.constant dense<0.000000e+00> : vector<8x128xf32>
    %134 = tpu.matmul %133, %15, %cst_36 {dimension_numbers = #tpu.dot_dimension_numbers<[1], [0], [0], [1], [0, 0, 1, 1], [], []>} : vector<8x32xf32>, vector<32x128xf32>, vector<8x128xf32> -> vector<8x128xf32>
    %135 = arith.addf %134, %5 : vector<8x128xf32>
    %c16 = arith.constant 16 : index
    %c0_37 = arith.constant 0 : index
    %136 = vector.load %arg8[%c16, %c0_37] : memref<64x128xf32, #tpu.memory_space<vmem>>, vector<8x128xf32>
    tpu.vector_store %arg8[%c16, %c0_37], %135 {strides = array<i32>} : memref<64x128xf32, #tpu.memory_space<vmem>>, vector<8x128xf32>,
    %137 = vector.extract_strided_slice %12 {offsets = [24, 0], sizes = [8, 128], strides = [1, 1]} : vector<64x128xf32> to vector<8x128xf32>
    %cst_38 = arith.constant dense<0.000000e+00> : vector<8x128xf32>
    %138 = tpu.matmul %115, %13, %cst_38 {dimension_numbers = #tpu.dot_dimension_numbers<[1], [0], [0], [1], [0, 0, 1, 1], [], []>} : vector<8x32xf32>, vector<32x128xf32>, vector<8x128xf32> -> vector<8x128xf32>
    %139 = arith.addf %137, %138 : vector<8x128xf32>
    %140 = arith.negf %139 : vector<8x128xf32>
    %141 = math.exp %140 : vector<8x128xf32>
    %cst_39 = arith.constant 1.000000e+00 : f32
    %142 = vector.broadcast %cst_39 : f32 to vector<8x128xf32>
    %143 = arith.addf %142, %141 : vector<8x128xf32>
    %144 = arith.divf %142, %143 : vector<8x128xf32>
    %145 = vector.extract_strided_slice %144 {offsets = [0, 0], sizes = [8, 32], strides = [1, 1]} : vector<8x128xf32> to vector<8x32xf32>
    %146 = vector.extract_strided_slice %144 {offsets = [0, 32], sizes = [8, 32], strides = [1, 1]} : vector<8x128xf32> to vector<8x32xf32>
    %147 = vector.extract_strided_slice %144 {offsets = [0, 96], sizes = [8, 32], strides = [1, 1]} : vector<8x128xf32> to vector<8x32xf32>
    %148 = vector.extract_strided_slice %139 {offsets = [0, 64], sizes = [8, 32], strides = [1, 1]} : vector<8x128xf32> to vector<8x32xf32>
    %149 = math.tanh %148 : vector<8x32xf32>
    %150 = arith.mulf %146, %113 : vector<8x32xf32>
    %151 = arith.mulf %145, %149 : vector<8x32xf32>
    %152 = arith.addf %150, %151 : vector<8x32xf32>
    %153 = math.tanh %152 : vector<8x32xf32>
    %154 = arith.mulf %147, %153 : vector<8x32xf32>
    %155 = tpu.concatenate %154, %133 in 1 : vector<8x32xf32>, vector<8x32xf32> -> vector<8x64xf32>
    %cst_40 = arith.constant dense<0.000000e+00> : vector<8x128xf32>
    %156 = tpu.matmul %155, %14, %cst_40 {dimension_numbers = #tpu.dot_dimension_numbers<[1], [0], [0], [1], [0, 0, 1, 1], [], []>} : vector<8x64xf32>, vector<64x128xf32>, vector<8x128xf32> -> vector<8x128xf32>
    %157 = arith.addf %156, %2 : vector<8x128xf32>
    %158 = arith.negf %157 : vector<8x128xf32>
    %159 = math.exp %158 : vector<8x128xf32>
    %cst_41 = arith.constant 1.000000e+00 : f32
    %160 = vector.broadcast %cst_41 : f32 to vector<8x128xf32>
    %161 = arith.addf %160, %159 : vector<8x128xf32>
    %162 = arith.divf %160, %161 : vector<8x128xf32>
    %163 = vector.extract_strided_slice %162 {offsets = [0, 0], sizes = [8, 32], strides = [1, 1]} : vector<8x128xf32> to vector<8x32xf32>
    %164 = vector.extract_strided_slice %162 {offsets = [0, 32], sizes = [8, 32], strides = [1, 1]} : vector<8x128xf32> to vector<8x32xf32>
    %165 = vector.extract_strided_slice %162 {offsets = [0, 96], sizes = [8, 32], strides = [1, 1]} : vector<8x128xf32> to vector<8x32xf32>
    %166 = vector.extract_strided_slice %157 {offsets = [0, 64], sizes = [8, 32], strides = [1, 1]} : vector<8x128xf32> to vector<8x32xf32>
    %167 = math.tanh %166 : vector<8x32xf32>
    %168 = arith.mulf %164, %131 : vector<8x32xf32>
    %169 = arith.mulf %163, %167 : vector<8x32xf32>
    %170 = arith.addf %168, %169 : vector<8x32xf32>
    %171 = math.tanh %170 : vector<8x32xf32>
    %172 = arith.mulf %165, %171 : vector<8x32xf32>
    %cst_42 = arith.constant dense<0.000000e+00> : vector<8x128xf32>
    %173 = tpu.matmul %172, %15, %cst_42 {dimension_numbers = #tpu.dot_dimension_numbers<[1], [0], [0], [1], [0, 0, 1, 1], [], []>} : vector<8x32xf32>, vector<32x128xf32>, vector<8x128xf32> -> vector<8x128xf32>
    %174 = arith.addf %173, %5 : vector<8x128xf32>
    %c24 = arith.constant 24 : index
    %c0_43 = arith.constant 0 : index
    %175 = vector.load %arg8[%c24, %c0_43] : memref<64x128xf32, #tpu.memory_space<vmem>>, vector<8x128xf32>
    tpu.vector_store %arg8[%c24, %c0_43], %174 {strides = array<i32>} : memref<64x128xf32, #tpu.memory_space<vmem>>, vector<8x128xf32>,
    %176 = vector.extract_strided_slice %12 {offsets = [32, 0], sizes = [8, 128], strides = [1, 1]} : vector<64x128xf32> to vector<8x128xf32>
    %cst_44 = arith.constant dense<0.000000e+00> : vector<8x128xf32>
    %177 = tpu.matmul %154, %13, %cst_44 {dimension_numbers = #tpu.dot_dimension_numbers<[1], [0], [0], [1], [0, 0, 1, 1], [], []>} : vector<8x32xf32>, vector<32x128xf32>, vector<8x128xf32> -> vector<8x128xf32>
    %178 = arith.addf %176, %177 : vector<8x128xf32>
    %179 = arith.negf %178 : vector<8x128xf32>
    %180 = math.exp %179 : vector<8x128xf32>
    %cst_45 = arith.constant 1.000000e+00 : f32
    %181 = vector.broadcast %cst_45 : f32 to vector<8x128xf32>
    %182 = arith.addf %181, %180 : vector<8x128xf32>
    %183 = arith.divf %181, %182 : vector<8x128xf32>
    %184 = vector.extract_strided_slice %183 {offsets = [0, 0], sizes = [8, 32], strides = [1, 1]} : vector<8x128xf32> to vector<8x32xf32>
    %185 = vector.extract_strided_slice %183 {offsets = [0, 32], sizes = [8, 32], strides = [1, 1]} : vector<8x128xf32> to vector<8x32xf32>
    %186 = vector.extract_strided_slice %183 {offsets = [0, 96], sizes = [8, 32], strides = [1, 1]} : vector<8x128xf32> to vector<8x32xf32>
    %187 = vector.extract_strided_slice %178 {offsets = [0, 64], sizes = [8, 32], strides = [1, 1]} : vector<8x128xf32> to vector<8x32xf32>
    %188 = math.tanh %187 : vector<8x32xf32>
    %189 = arith.mulf %185, %152 : vector<8x32xf32>
    %190 = arith.mulf %184, %188 : vector<8x32xf32>
    %191 = arith.addf %189, %190 : vector<8x32xf32>
    %192 = math.tanh %191 : vector<8x32xf32>
    %193 = arith.mulf %186, %192 : vector<8x32xf32>
    %194 = tpu.concatenate %193, %172 in 1 : vector<8x32xf32>, vector<8x32xf32> -> vector<8x64xf32>
    %cst_46 = arith.constant dense<0.000000e+00> : vector<8x128xf32>
    %195 = tpu.matmul %194, %14, %cst_46 {dimension_numbers = #tpu.dot_dimension_numbers<[1], [0], [0], [1], [0, 0, 1, 1], [], []>} : vector<8x64xf32>, vector<64x128xf32>, vector<8x128xf32> -> vector<8x128xf32>
    %196 = arith.addf %195, %2 : vector<8x128xf32>
    %197 = arith.negf %196 : vector<8x128xf32>
    %198 = math.exp %197 : vector<8x128xf32>
    %cst_47 = arith.constant 1.000000e+00 : f32
    %199 = vector.broadcast %cst_47 : f32 to vector<8x128xf32>
    %200 = arith.addf %199, %198 : vector<8x128xf32>
    %201 = arith.divf %199, %200 : vector<8x128xf32>
    %202 = vector.extract_strided_slice %201 {offsets = [0, 0], sizes = [8, 32], strides = [1, 1]} : vector<8x128xf32> to vector<8x32xf32>
    %203 = vector.extract_strided_slice %201 {offsets = [0, 32], sizes = [8, 32], strides = [1, 1]} : vector<8x128xf32> to vector<8x32xf32>
    %204 = vector.extract_strided_slice %201 {offsets = [0, 96], sizes = [8, 32], strides = [1, 1]} : vector<8x128xf32> to vector<8x32xf32>
    %205 = vector.extract_strided_slice %196 {offsets = [0, 64], sizes = [8, 32], strides = [1, 1]} : vector<8x128xf32> to vector<8x32xf32>
    %206 = math.tanh %205 : vector<8x32xf32>
    %207 = arith.mulf %203, %170 : vector<8x32xf32>
    %208 = arith.mulf %202, %206 : vector<8x32xf32>
    %209 = arith.addf %207, %208 : vector<8x32xf32>
    %210 = math.tanh %209 : vector<8x32xf32>
    %211 = arith.mulf %204, %210 : vector<8x32xf32>
    %cst_48 = arith.constant dense<0.000000e+00> : vector<8x128xf32>
    %212 = tpu.matmul %211, %15, %cst_48 {dimension_numbers = #tpu.dot_dimension_numbers<[1], [0], [0], [1], [0, 0, 1, 1], [], []>} : vector<8x32xf32>, vector<32x128xf32>, vector<8x128xf32> -> vector<8x128xf32>
    %213 = arith.addf %212, %5 : vector<8x128xf32>
    %c32 = arith.constant 32 : index
    %c0_49 = arith.constant 0 : index
    %214 = vector.load %arg8[%c32, %c0_49] : memref<64x128xf32, #tpu.memory_space<vmem>>, vector<8x128xf32>
    tpu.vector_store %arg8[%c32, %c0_49], %213 {strides = array<i32>} : memref<64x128xf32, #tpu.memory_space<vmem>>, vector<8x128xf32>,
    %215 = vector.extract_strided_slice %12 {offsets = [40, 0], sizes = [8, 128], strides = [1, 1]} : vector<64x128xf32> to vector<8x128xf32>
    %cst_50 = arith.constant dense<0.000000e+00> : vector<8x128xf32>
    %216 = tpu.matmul %193, %13, %cst_50 {dimension_numbers = #tpu.dot_dimension_numbers<[1], [0], [0], [1], [0, 0, 1, 1], [], []>} : vector<8x32xf32>, vector<32x128xf32>, vector<8x128xf32> -> vector<8x128xf32>
    %217 = arith.addf %215, %216 : vector<8x128xf32>
    %218 = arith.negf %217 : vector<8x128xf32>
    %219 = math.exp %218 : vector<8x128xf32>
    %cst_51 = arith.constant 1.000000e+00 : f32
    %220 = vector.broadcast %cst_51 : f32 to vector<8x128xf32>
    %221 = arith.addf %220, %219 : vector<8x128xf32>
    %222 = arith.divf %220, %221 : vector<8x128xf32>
    %223 = vector.extract_strided_slice %222 {offsets = [0, 0], sizes = [8, 32], strides = [1, 1]} : vector<8x128xf32> to vector<8x32xf32>
    %224 = vector.extract_strided_slice %222 {offsets = [0, 32], sizes = [8, 32], strides = [1, 1]} : vector<8x128xf32> to vector<8x32xf32>
    %225 = vector.extract_strided_slice %222 {offsets = [0, 96], sizes = [8, 32], strides = [1, 1]} : vector<8x128xf32> to vector<8x32xf32>
    %226 = vector.extract_strided_slice %217 {offsets = [0, 64], sizes = [8, 32], strides = [1, 1]} : vector<8x128xf32> to vector<8x32xf32>
    %227 = math.tanh %226 : vector<8x32xf32>
    %228 = arith.mulf %224, %191 : vector<8x32xf32>
    %229 = arith.mulf %223, %227 : vector<8x32xf32>
    %230 = arith.addf %228, %229 : vector<8x32xf32>
    %231 = math.tanh %230 : vector<8x32xf32>
    %232 = arith.mulf %225, %231 : vector<8x32xf32>
    %233 = tpu.concatenate %232, %211 in 1 : vector<8x32xf32>, vector<8x32xf32> -> vector<8x64xf32>
    %cst_52 = arith.constant dense<0.000000e+00> : vector<8x128xf32>
    %234 = tpu.matmul %233, %14, %cst_52 {dimension_numbers = #tpu.dot_dimension_numbers<[1], [0], [0], [1], [0, 0, 1, 1], [], []>} : vector<8x64xf32>, vector<64x128xf32>, vector<8x128xf32> -> vector<8x128xf32>
    %235 = arith.addf %234, %2 : vector<8x128xf32>
    %236 = arith.negf %235 : vector<8x128xf32>
    %237 = math.exp %236 : vector<8x128xf32>
    %cst_53 = arith.constant 1.000000e+00 : f32
    %238 = vector.broadcast %cst_53 : f32 to vector<8x128xf32>
    %239 = arith.addf %238, %237 : vector<8x128xf32>
    %240 = arith.divf %238, %239 : vector<8x128xf32>
    %241 = vector.extract_strided_slice %240 {offsets = [0, 0], sizes = [8, 32], strides = [1, 1]} : vector<8x128xf32> to vector<8x32xf32>
    %242 = vector.extract_strided_slice %240 {offsets = [0, 32], sizes = [8, 32], strides = [1, 1]} : vector<8x128xf32> to vector<8x32xf32>
    %243 = vector.extract_strided_slice %240 {offsets = [0, 96], sizes = [8, 32], strides = [1, 1]} : vector<8x128xf32> to vector<8x32xf32>
    %244 = vector.extract_strided_slice %235 {offsets = [0, 64], sizes = [8, 32], strides = [1, 1]} : vector<8x128xf32> to vector<8x32xf32>
    %245 = math.tanh %244 : vector<8x32xf32>
    %246 = arith.mulf %242, %209 : vector<8x32xf32>
    %247 = arith.mulf %241, %245 : vector<8x32xf32>
    %248 = arith.addf %246, %247 : vector<8x32xf32>
    %249 = math.tanh %248 : vector<8x32xf32>
    %250 = arith.mulf %243, %249 : vector<8x32xf32>
    %cst_54 = arith.constant dense<0.000000e+00> : vector<8x128xf32>
    %251 = tpu.matmul %250, %15, %cst_54 {dimension_numbers = #tpu.dot_dimension_numbers<[1], [0], [0], [1], [0, 0, 1, 1], [], []>} : vector<8x32xf32>, vector<32x128xf32>, vector<8x128xf32> -> vector<8x128xf32>
    %252 = arith.addf %251, %5 : vector<8x128xf32>
    %c40 = arith.constant 40 : index
    %c0_55 = arith.constant 0 : index
    %253 = vector.load %arg8[%c40, %c0_55] : memref<64x128xf32, #tpu.memory_space<vmem>>, vector<8x128xf32>
    tpu.vector_store %arg8[%c40, %c0_55], %252 {strides = array<i32>} : memref<64x128xf32, #tpu.memory_space<vmem>>, vector<8x128xf32>,
    %254 = vector.extract_strided_slice %12 {offsets = [48, 0], sizes = [8, 128], strides = [1, 1]} : vector<64x128xf32> to vector<8x128xf32>
    %cst_56 = arith.constant dense<0.000000e+00> : vector<8x128xf32>
    %255 = tpu.matmul %232, %13, %cst_56 {dimension_numbers = #tpu.dot_dimension_numbers<[1], [0], [0], [1], [0, 0, 1, 1], [], []>} : vector<8x32xf32>, vector<32x128xf32>, vector<8x128xf32> -> vector<8x128xf32>
    %256 = arith.addf %254, %255 : vector<8x128xf32>
    %257 = arith.negf %256 : vector<8x128xf32>
    %258 = math.exp %257 : vector<8x128xf32>
    %cst_57 = arith.constant 1.000000e+00 : f32
    %259 = vector.broadcast %cst_57 : f32 to vector<8x128xf32>
    %260 = arith.addf %259, %258 : vector<8x128xf32>
    %261 = arith.divf %259, %260 : vector<8x128xf32>
    %262 = vector.extract_strided_slice %261 {offsets = [0, 0], sizes = [8, 32], strides = [1, 1]} : vector<8x128xf32> to vector<8x32xf32>
    %263 = vector.extract_strided_slice %261 {offsets = [0, 32], sizes = [8, 32], strides = [1, 1]} : vector<8x128xf32> to vector<8x32xf32>
    %264 = vector.extract_strided_slice %261 {offsets = [0, 96], sizes = [8, 32], strides = [1, 1]} : vector<8x128xf32> to vector<8x32xf32>
    %265 = vector.extract_strided_slice %256 {offsets = [0, 64], sizes = [8, 32], strides = [1, 1]} : vector<8x128xf32> to vector<8x32xf32>
    %266 = math.tanh %265 : vector<8x32xf32>
    %267 = arith.mulf %263, %230 : vector<8x32xf32>
    %268 = arith.mulf %262, %266 : vector<8x32xf32>
    %269 = arith.addf %267, %268 : vector<8x32xf32>
    %270 = math.tanh %269 : vector<8x32xf32>
    %271 = arith.mulf %264, %270 : vector<8x32xf32>
    %272 = tpu.concatenate %271, %250 in 1 : vector<8x32xf32>, vector<8x32xf32> -> vector<8x64xf32>
    %cst_58 = arith.constant dense<0.000000e+00> : vector<8x128xf32>
    %273 = tpu.matmul %272, %14, %cst_58 {dimension_numbers = #tpu.dot_dimension_numbers<[1], [0], [0], [1], [0, 0, 1, 1], [], []>} : vector<8x64xf32>, vector<64x128xf32>, vector<8x128xf32> -> vector<8x128xf32>
    %274 = arith.addf %273, %2 : vector<8x128xf32>
    %275 = arith.negf %274 : vector<8x128xf32>
    %276 = math.exp %275 : vector<8x128xf32>
    %cst_59 = arith.constant 1.000000e+00 : f32
    %277 = vector.broadcast %cst_59 : f32 to vector<8x128xf32>
    %278 = arith.addf %277, %276 : vector<8x128xf32>
    %279 = arith.divf %277, %278 : vector<8x128xf32>
    %280 = vector.extract_strided_slice %279 {offsets = [0, 0], sizes = [8, 32], strides = [1, 1]} : vector<8x128xf32> to vector<8x32xf32>
    %281 = vector.extract_strided_slice %279 {offsets = [0, 32], sizes = [8, 32], strides = [1, 1]} : vector<8x128xf32> to vector<8x32xf32>
    %282 = vector.extract_strided_slice %279 {offsets = [0, 96], sizes = [8, 32], strides = [1, 1]} : vector<8x128xf32> to vector<8x32xf32>
    %283 = vector.extract_strided_slice %274 {offsets = [0, 64], sizes = [8, 32], strides = [1, 1]} : vector<8x128xf32> to vector<8x32xf32>
    %284 = math.tanh %283 : vector<8x32xf32>
    %285 = arith.mulf %281, %248 : vector<8x32xf32>
    %286 = arith.mulf %280, %284 : vector<8x32xf32>
    %287 = arith.addf %285, %286 : vector<8x32xf32>
    %288 = math.tanh %287 : vector<8x32xf32>
    %289 = arith.mulf %282, %288 : vector<8x32xf32>
    %cst_60 = arith.constant dense<0.000000e+00> : vector<8x128xf32>
    %290 = tpu.matmul %289, %15, %cst_60 {dimension_numbers = #tpu.dot_dimension_numbers<[1], [0], [0], [1], [0, 0, 1, 1], [], []>} : vector<8x32xf32>, vector<32x128xf32>, vector<8x128xf32> -> vector<8x128xf32>
    %291 = arith.addf %290, %5 : vector<8x128xf32>
    %c48 = arith.constant 48 : index
    %c0_61 = arith.constant 0 : index
    %292 = vector.load %arg8[%c48, %c0_61] : memref<64x128xf32, #tpu.memory_space<vmem>>, vector<8x128xf32>
    tpu.vector_store %arg8[%c48, %c0_61], %291 {strides = array<i32>} : memref<64x128xf32, #tpu.memory_space<vmem>>, vector<8x128xf32>,
    %293 = vector.extract_strided_slice %12 {offsets = [56, 0], sizes = [8, 128], strides = [1, 1]} : vector<64x128xf32> to vector<8x128xf32>
    %cst_62 = arith.constant dense<0.000000e+00> : vector<8x128xf32>
    %294 = tpu.matmul %271, %13, %cst_62 {dimension_numbers = #tpu.dot_dimension_numbers<[1], [0], [0], [1], [0, 0, 1, 1], [], []>} : vector<8x32xf32>, vector<32x128xf32>, vector<8x128xf32> -> vector<8x128xf32>
    %295 = arith.addf %293, %294 : vector<8x128xf32>
    %296 = arith.negf %295 : vector<8x128xf32>
    %297 = math.exp %296 : vector<8x128xf32>
    %cst_63 = arith.constant 1.000000e+00 : f32
    %298 = vector.broadcast %cst_63 : f32 to vector<8x128xf32>
    %299 = arith.addf %298, %297 : vector<8x128xf32>
    %300 = arith.divf %298, %299 : vector<8x128xf32>
    %301 = vector.extract_strided_slice %300 {offsets = [0, 0], sizes = [8, 32], strides = [1, 1]} : vector<8x128xf32> to vector<8x32xf32>
    %302 = vector.extract_strided_slice %300 {offsets = [0, 32], sizes = [8, 32], strides = [1, 1]} : vector<8x128xf32> to vector<8x32xf32>
    %303 = vector.extract_strided_slice %300 {offsets = [0, 96], sizes = [8, 32], strides = [1, 1]} : vector<8x128xf32> to vector<8x32xf32>
    %304 = vector.extract_strided_slice %295 {offsets = [0, 64], sizes = [8, 32], strides = [1, 1]} : vector<8x128xf32> to vector<8x32xf32>
    %305 = math.tanh %304 : vector<8x32xf32>
    %306 = arith.mulf %302, %269 : vector<8x32xf32>
    %307 = arith.mulf %301, %305 : vector<8x32xf32>
    %308 = arith.addf %306, %307 : vector<8x32xf32>
    %309 = math.tanh %308 : vector<8x32xf32>
    %310 = arith.mulf %303, %309 : vector<8x32xf32>
    %311 = tpu.concatenate %310, %289 in 1 : vector<8x32xf32>, vector<8x32xf32> -> vector<8x64xf32>
    %cst_64 = arith.constant dense<0.000000e+00> : vector<8x128xf32>
    %312 = tpu.matmul %311, %14, %cst_64 {dimension_numbers = #tpu.dot_dimension_numbers<[1], [0], [0], [1], [0, 0, 1, 1], [], []>} : vector<8x64xf32>, vector<64x128xf32>, vector<8x128xf32> -> vector<8x128xf32>
    %313 = arith.addf %312, %2 : vector<8x128xf32>
    %314 = arith.negf %313 : vector<8x128xf32>
    %315 = math.exp %314 : vector<8x128xf32>
    %cst_65 = arith.constant 1.000000e+00 : f32
    %316 = vector.broadcast %cst_65 : f32 to vector<8x128xf32>
    %317 = arith.addf %316, %315 : vector<8x128xf32>
    %318 = arith.divf %316, %317 : vector<8x128xf32>
    %319 = vector.extract_strided_slice %318 {offsets = [0, 0], sizes = [8, 32], strides = [1, 1]} : vector<8x128xf32> to vector<8x32xf32>
    %320 = vector.extract_strided_slice %318 {offsets = [0, 32], sizes = [8, 32], strides = [1, 1]} : vector<8x128xf32> to vector<8x32xf32>
    %321 = vector.extract_strided_slice %318 {offsets = [0, 96], sizes = [8, 32], strides = [1, 1]} : vector<8x128xf32> to vector<8x32xf32>
    %322 = vector.extract_strided_slice %313 {offsets = [0, 64], sizes = [8, 32], strides = [1, 1]} : vector<8x128xf32> to vector<8x32xf32>
    %323 = math.tanh %322 : vector<8x32xf32>
    %324 = arith.mulf %320, %287 : vector<8x32xf32>
    %325 = arith.mulf %319, %323 : vector<8x32xf32>
    %326 = arith.addf %324, %325 : vector<8x32xf32>
    %327 = math.tanh %326 : vector<8x32xf32>
    %328 = arith.mulf %321, %327 : vector<8x32xf32>
    %cst_66 = arith.constant dense<0.000000e+00> : vector<8x128xf32>
    %329 = tpu.matmul %328, %15, %cst_66 {dimension_numbers = #tpu.dot_dimension_numbers<[1], [0], [0], [1], [0, 0, 1, 1], [], []>} : vector<8x32xf32>, vector<32x128xf32>, vector<8x128xf32> -> vector<8x128xf32>
    %330 = arith.addf %329, %5 : vector<8x128xf32>
    %c56 = arith.constant 56 : index
    %c0_67 = arith.constant 0 : index
    %331 = vector.load %arg8[%c56, %c0_67] : memref<64x128xf32, #tpu.memory_space<vmem>>, vector<8x128xf32>
    tpu.vector_store %arg8[%c56, %c0_67], %330 {strides = array<i32>} : memref<64x128xf32, #tpu.memory_space<vmem>>, vector<8x128xf32>,
    return
  }
}

</mosaic_0001>

<bundles_post_ra>
// kernel: tpu_custom_call.1
= control target key start
LH: loop header
LB: loop body
LE: loop exit
PB: predicated region body
PF: predicated region fallthrough
CT: control target
= control target key end

     0   :  { %13 = vsyncpa [#allocation3], 0  ;;  %s2194_s0 = inlined_call_operand.vmem [shape: f32[64,32], index: 0, kind: input, shape index: {}]   ;;  %s2195_s1 = inlined_call_operand.vmem [shape: f32[32,128], index: 1, kind: input, shape index: {}]   ;;  %s2196_s2 = inlined_call_operand.hbm [shape: f32[32,128], index: 2, kind: input, shape index: {}]   ;;  %s2197_s3 = inlined_call_operand.vmem [shape: f32[1,128], index: 3, kind: input, shape index: {}]   ;;  %s2198_s4 = inlined_call_operand.vmem [shape: f32[64,128], index: 4, kind: input, shape index: {}]   ;;  %s2199_s5 = inlined_call_operand.vmem [shape: f32[1,128], index: 5, kind: input, shape index: {}]   ;;  %s2200_s6 = inlined_call_operand.hbm [shape: f32[32,128], index: 6, kind: input, shape index: {}]   ;;  %s2201_s7 = inlined_call_operand.vmem [shape: f32[1,128], index: 7, kind: input, shape index: {}]   ;;  %s2202_s8 = inlined_call_operand.hbm [shape: f32[64,128], index: 8, kind: output, shape index: {}]  }
   0x1   :  { %14 = vsyncpa [#allocation6], 0 }
   0x2   :  { %15 = vsyncpa [#allocation4], 0  ;;  %s24_s29 = sshll.u32 %s2196_s2, 4  ;;  %s1694_s30 = smov [#allocation2]   ;;  %s25_s29 = int_to_ptr.hbm [resolvable:$true] %s24_s29 }
   0x3   :  { %s26_s9 = sshll.u32 %s1694_s30, 4  ;;  %s43_s12 = sshll.u32 %s2200_s6, 4  ;;  %s27_s9 = int_to_ptr.vmem [resolvable:$true] %s26_s9  ;;  %s44_s12 = int_to_ptr.hbm [resolvable:$true] %s43_s12 }
   0x4   :  { %s1695_s13 = smov 128   ;;  %s1696_s14 = smov 8  }
   0x5   :  { %32 = dma.hbm_to_vmem [thread:$0]  %s25_s29, 512, %s27_s9, [#allocation3], %s1695_s13, %s1695_s13, %s1696_s14  }
   0x6   :  { %s1697_s15 = smov [#allocation5]  }
   0x7   :  { %s45_s16 = sshll.u32 %s1697_s15, 4  ;;  %s46_s16 = int_to_ptr.vmem [resolvable:$true] %s45_s16 }
   0x8   :  { %51 = dma.hbm_to_vmem [thread:$0]  %s44_s12, 512, %s46_s16, [#allocation6], %s1695_s13, %s1695_s13, %s1696_s14  }
   0x9   :  { %1688 = dma.done.wait [#allocation3], 512  }
   0xa   :  { %1689 = vsyncadd [#allocation3], 4294966784 }
   0xb   :  { %1690 = dma.done.wait [#allocation6], 512  }
   0xc   :  { %1691 = vsyncadd [#allocation6], 4294966784  ;;  %v81_v0 = vld [vmem:[%s2195_s1 + $0x18] sm:$0xff]  ;;  %v80_v1 = vld [vmem:[%s2195_s1 + $0x10] sm:$0xff]  ;;  %vm86_vm0 = vcmask 261120   ;;  %v1698_v9 = vmov 0.0  }
   0xd   :  { %v1765_v2 = vld [vmem:[#allocation2 + $0x18] sm:$0xff]  ;;  %123 = vmatpush.msra.mxu0 %v81_v0  ;;  %v1768_v3 = vld [vmem:[#allocation2 + $0x10] sm:$0xff]  ;;  %v79_v4 = vld [vmem:[%s2195_s1 + $0x8] sm:$0xff]  ;;  %s1699_s26 = smov 64   ;;  %s1700_s27 = smov 32   ;;  %vm234_vm5 = vcmask 523264  }
   0xe   :  { %183 = vmatpush.msra.mxu1 %v1765_v2  ;;  %v1773_v5 = vld [vmem:[#allocation2 + $0x8] sm:$0xff]  ;;  %v78_v6 = vld [vmem:[%s2195_s1] sm:$0xff]  ;;  %v1806_v35 = vld [vmem:[%s2198_s4 + $0x38] sm:$0xff]  ;;  %s1405_s23 = sshll.u32 %s2202_s8, 4  ;;  %s1406_s23 = int_to_ptr.hbm [resolvable:$true] %s1405_s23 }
   0xf   :  { %124 = vmatpush.msra.mxu0 %v80_v1  ;;  %v1779_v7 = vld [vmem:[#allocation2] sm:$0xff]  ;;  %v1811_v36 = vld [vmem:[%s2198_s4 + $0x30] sm:$0xff]  ;;  %246 = vmatpush.msra.mxu2 %v1806_v35  ;;  %v1818_v37 = vld [vmem:[%s2198_s4 + $0x28] sm:$0xff] }
  0x10   :  { %184 = vmatpush.msra.mxu1 %v1768_v3  ;;  %v70_v8 = vld [vmem:[%s2194_s0] sm:$0xff]  ;;  %v71_v38 = vld [vmem:[%s2194_s0 + $0x8] sm:$0xff]  ;;  %v1835_v40 = vld [vmem:[%s2198_s4 + $0x18] sm:$0xff] }
  0x11   :  { %125 = vmatpush.msra.mxu0 %v79_v4  ;;  %v1794_v10 = vld [vmem:[%s2197_s3] ss:$0 sm:$0xff]  ;;  %247 = vmatpush.msra.mxu2 %v1811_v36  ;;  %v1842_v41 = vld [vmem:[%s2198_s4 + $0x10] sm:$0xff]  ;;  %v1849_v42 = vld [vmem:[%s2198_s4 + $0x8] sm:$0xff] }
  0x12   :  { %185 = vmatpush.msra.mxu1 %v1773_v5  ;;  %v1828_v39 = vld [vmem:[%s2198_s4 + $0x20] sm:$0xff] }
  0x13   :  { %126 = vmatpush.msra.mxu0 %v78_v6  ;;  %248 = vmatpush.msra.mxu2 %v1818_v37  ;;  %v1860_v45 = vld [vmem:[%s2198_s4] sm:$0xff] }
  0x14   :  { %186 = vmatpush.msra.mxu1 %v1779_v7  ;;  %1419 = vmatmul.msk.f32.vlgmr.msra.gmra.mxu0 %vm86_vm0, %v70_v8  ;;  %v1882_v48 = vld [vmem:[%s2199_s5] ss:$0 sm:$0xff] }
  0x15   :  { %187 = vmatmul.f32.vlgmr.msra.gmra.mxu1 %v1698_v9  ;;  %1016 = vmatpush.msrb.mxu0 %v1806_v35 }
  0x16   :  { %335 = vmatpush.msrb.mxu1 %v1765_v2  ;;  %249 = vmatpush.msra.mxu2 %v1828_v39 }
  0x17   :  { %1017 = vmatpush.msrb.mxu0 %v1811_v36 }
  0x18   :  { %336 = vmatpush.msrb.mxu1 %v1768_v3  ;;  %250 = vmatpush.msra.mxu2 %v1835_v40 }
  0x19   :  { %1018 = vmatpush.msrb.mxu0 %v1818_v37 }
  0x1a   :  { %337 = vmatpush.msrb.mxu1 %v1773_v5  ;;  %251 = vmatpush.msra.mxu2 %v1842_v41 }
  0x1b   :  { %1019 = vmatpush.msrb.mxu0 %v1828_v39 }
  0x1c   :  { %338 = vmatpush.msrb.mxu1 %v1779_v7  ;;  %1420 = vmatmul.msk.f32.gmra.mxu0 %vm86_vm0, %v71_v38 }
  0x1d   :  { %1020 = vmatpush.msrb.mxu0 %v1835_v40  ;;  %252 = vmatpush.msra.mxu2 %v1849_v42 }
  0x1f   :  { %1021 = vmatpush.msrb.mxu0 %v1842_v41  ;;  %253 = vmatpush.msra.mxu2 %v1860_v45 }
  0x21   :  { %1022 = vmatpush.msrb.mxu0 %v1849_v42  ;;  %489 = vmatpush.msrb.mxu2 %v1765_v2 }
  0x23   :  { %1023 = vmatpush.msrb.mxu0 %v1860_v45  ;;  %490 = vmatpush.msrb.mxu2 %v1768_v3 }
  0x25   :  { %1324 = vmatpush.msra.mxu0 %v1806_v35  ;;  %491 = vmatpush.msrb.mxu2 %v1773_v5 }
  0x27   :  { %1325 = vmatpush.msra.mxu0 %v1811_v36  ;;  %492 = vmatpush.msrb.mxu2 %v1779_v7 }
  0x29   :  { %1326 = vmatpush.msra.mxu0 %v1818_v37 }
  0x2b   :  { %1327 = vmatpush.msra.mxu0 %v1828_v39 }
  0x2d   :  { %1328 = vmatpush.msra.mxu0 %v1835_v40 }
  0x2f   :  { %1329 = vmatpush.msra.mxu0 %v1842_v41 }
  0x31   :  { %1330 = vmatpush.msra.mxu0 %v1849_v42 }
  0x33   :  { %1331 = vmatpush.msra.mxu0 %v1860_v45 }
  0x91   :  { %v128_v11 = vpop.f32.mrf.mxu0 }
  0x92   :  { %v188_v12 = vpop.f32.mrf.mxu1  ;;  %v129_v13 = vadd.f32 %v1794_v10, %v128_v11 }
  0x94   :  { %v191_v14 = vadd.f32 %v188_v12, %v129_v13 }
  0x96   :  { %1477 = vtanh.f32 %v191_v14  ;;  %v1427_v16 = vmul.f32 -1.442695, %v191_v14 }
  0x98   :  { %1479 = vpow2.f32 %v1427_v16 }
  0x99   :  { %v131_v49 = vpop.f32.mrf.mxu0 }
  0x9a   :  { %v132_v52 = vadd.f32 %v1794_v10, %v131_v49  ;;  %v1907_v49 = vld [vmem:[#allocation5 + $0x8] sm:$0xff] }
  0x9c   :  { %v1478_v15 = vpop.eup %1477 }
  0x9d   :  { %214 = vrot.lane.b32.xlu0 %v1478_v15, %s1699_s26 }
  0x9e   :  { %v1480_v17 = vpop.eup %1479 }
  0x9f   :  { %v195_v18 = vadd.f32 1.0, %v1480_v17 }
  0xa1   :  { %1481 = vrcp.f32 %v195_v18  ;;  %v207_v24 = vand.u32 2147483648, %v195_v18  ;;  %vm201_vm2 = vweird.f32 %v195_v18  ;;  %v205_v25 = vand.u32 2147483647, %v195_v18 }
  0xa3   :  { %v208_v27 = vor.u32 1.1754944e-38, %v207_v24  ;;  %vm206_vm4 = vcmp.eq.f32.partialorder %v205_v25, 8.507059e+37 }
  0xa7   :  { %v1482_v19 = vpop.eup %1481 }
  0xa8   :  { %v197_v20 = vmul.f32 %v1482_v19, %v195_v18  ;;  %vm202_vm1 = vweird.f32 %v1482_v19 }
  0xa9   :  { %vm203_vm3 = vmor %vm201_vm2, %vm202_vm1 }
  0xaa   :  { %v198_v21 = vsub.f32 1.0, %v197_v20 }
  0xac   :  { %v199_v22 = vmul.f32 %v1482_v19, %v198_v21 }
  0xae   :  { %v200_v23 = vadd.f32 %v1482_v19, %v199_v22 }
  0xb0   :  { %v204_v26 = vsel %vm203_vm3, %v1482_v19, %v200_v23 }
  0xb1   :  { %v209_v29 = vsel %vm206_vm4, %v208_v27, %v204_v26 }
  0xb2   :  { %v212_v31 = vmul.f32 0.0, %v209_v29 }
 0x10f   :  { %v215_v28 = vpop.permute.xlu0 %214 }
 0x110   :  { %v217_v30 = vmul.f32 %v215_v28, %v209_v29 }
 0x112   :  { %219 = vrot.lane.b32.xlu0 %v217_v30, %s1700_s27 }
 0x184   :  { %v220_v32 = vpop.permute.xlu0 %219 }
 0x185   :  { %v1799_v33 = vadd.f32 %v220_v32, %v212_v31 }
 0x187   :  { %1483 = vtanh.f32 %v1799_v33 }
 0x18d   :  { %v1484_v34 = vpop.eup %1483 }
 0x18e   :  { %225 = vrot.lane.b32.xlu1 %v1484_v34, %s1699_s26 }
 0x200   :  { %v226_v43 = vpop.permute.xlu1 %225 }
 0x201   :  { %v228_v44 = vmul.f32 %v226_v43, %v209_v29 }
 0x203   :  { %230 = vrot.lane.b32.xlu1 %v228_v44, %s1700_s27 }
 0x275   :  { %v231_v46 = vpop.permute.xlu1 %230 }
 0x276   :  { %1431 = vmatmul.msk.f32.vlgmr.msrb.gmra.mxu1 %vm86_vm0, %v231_v46  ;;  %v233_v47 = vsel %vm86_vm0, %v231_v46, 0.0 }
 0x277   :  { %1428 = vmatmul.msk.f32.vlgmr.msra.gmra.mxu2 %vm234_vm5, %v233_v47  ;;  %v1901_v47 = vld [vmem:[#allocation5 + $0x18] sm:$0xff] }
 0x278   :  { %312 = vmatpush.msra.mxu3 %v1901_v47  ;;  %466 = vmatpush.msra.mxu1 %v1901_v47 }
 0x279   :  { %620 = vmatpush.msra.mxu2 %v1901_v47 }
 0x2f3   :  { %v340_v53 = vpop.f32.mrf.mxu1 }
 0x2f4   :  { %v343_v54 = vadd.f32 %v340_v53, %v132_v52  ;;  %v72_v53 = vld [vmem:[%s2194_s0 + $0x10] sm:$0xff] }
 0x2f5   :  { %1421 = vmatmul.msk.f32.gmra.mxu0 %vm86_vm0, %v72_v53 }
 0x2f6   :  { %v1432_v58 = vmul.f32 -1.442695, %v343_v54 }
 0x2fa   :  { %v255_v50 = vpop.f32.mrf.mxu2 }
 0x2fb   :  { %v256_v51 = vadd.f32 %v1882_v48, %v255_v50  ;;  %v1912_v50 = vld [vmem:[#allocation5] sm:$0xff] }
 0x2fd   :  { %1485 = vtanh.f32 %v256_v51  ;;  %v1429_v57 = vmul.f32 -1.442695, %v256_v51 }
 0x2fe   :  { %1487 = vtanh.f32 %v343_v54 }
 0x2ff   :  { %1489 = vpow2.f32 %v1429_v57 }
 0x300   :  { %1491 = vpow2.f32 %v1432_v58  ;;  %v1965_v58 = vld [vmem:[%s2201_s7] ss:$0 sm:$0xff] }
 0x303   :  { %v1486_v55 = vpop.eup %1485 }
 0x304   :  { %280 = vrot.lane.b32.xlu2 %v1486_v55, %s1699_s26  ;;  %v1488_v56 = vpop.eup %1487 }
 0x305   :  { %v1490_v59 = vpop.eup %1489 }
 0x306   :  { %v261_v60 = vadd.f32 1.0, %v1490_v59  ;;  %v1492_v61 = vpop.eup %1491 }
 0x307   :  { %v347_v62 = vadd.f32 1.0, %v1492_v61 }
 0x308   :  { %1493 = vrcp.f32 %v261_v60  ;;  %v273_v12 = vand.u32 2147483648, %v261_v60  ;;  %vm267_vm7 = vweird.f32 %v261_v60  ;;  %v271_v13 = vand.u32 2147483647, %v261_v60 }
 0x309   :  { %1495 = vrcp.f32 %v347_v62  ;;  %v359_v21 = vand.u32 2147483648, %v347_v62  ;;  %vm353_vm11 = vweird.f32 %v347_v62  ;;  %v357_v22 = vand.u32 2147483647, %v347_v62 }
 0x30a   :  { %v274_v16 = vor.u32 1.1754944e-38, %v273_v12  ;;  %vm272_vm9 = vcmp.eq.f32.partialorder %v271_v13, 8.507059e+37 }
 0x30b   :  { %v360_v24 = vor.u32 1.1754944e-38, %v359_v21  ;;  %vm358_vm13 = vcmp.eq.f32.partialorder %v357_v22, 8.507059e+37 }
 0x30c   :  { %366 = vrot.lane.b32.xlu2 %v1488_v56, %s1699_s26 }
 0x30e   :  { %v1494_v63 = vpop.eup %1493 }
 0x30f   :  { %v263_v0 = vmul.f32 %v1494_v63, %v261_v60  ;;  %v1496_v4 = vpop.eup %1495  ;;  %vm268_vm6 = vweird.f32 %v1494_v63 }
 0x310   :  { %v349_v8 = vmul.f32 %v1496_v4, %v347_v62  ;;  %vm269_vm8 = vmor %vm267_vm7, %vm268_vm6  ;;  %vm354_vm10 = vweird.f32 %v1496_v4 }
 0x311   :  { %v264_v1 = vsub.f32 1.0, %v263_v0  ;;  %vm355_vm12 = vmor %vm353_vm11, %vm354_vm10 }
 0x312   :  { %v350_v11 = vsub.f32 1.0, %v349_v8 }
 0x313   :  { %v265_v6 = vmul.f32 %v1494_v63, %v264_v1 }
 0x314   :  { %v351_v15 = vmul.f32 %v1496_v4, %v350_v11 }
 0x315   :  { %v266_v9 = vadd.f32 %v1494_v63, %v265_v6 }
 0x316   :  { %v352_v20 = vadd.f32 %v1496_v4, %v351_v15 }
 0x317   :  { %v270_v14 = vsel %vm269_vm8, %v1494_v63, %v266_v9 }
 0x318   :  { %v275_v18 = vsel %vm272_vm9, %v274_v16, %v270_v14  ;;  %v356_v23 = vsel %vm355_vm12, %v1496_v4, %v352_v20 }
 0x319   :  { %v361_v25 = vsel %vm358_vm13, %v360_v24, %v356_v23  ;;  %v278_v28 = vmul.f32 0.0, %v275_v18 }
 0x31a   :  { %v364_v31 = vmul.f32 %v361_v25, %v1799_v33  ;;  %v1903_v33 = vld [vmem:[#allocation5 + $0x10] sm:$0xff] }
 0x31b   :  { %313 = vmatpush.msra.mxu3 %v1903_v33  ;;  %467 = vmatpush.msra.mxu1 %v1903_v33 }
 0x31c   :  { %621 = vmatpush.msra.mxu2 %v1903_v33 }
 0x31d   :  { %314 = vmatpush.msra.mxu3 %v1907_v49  ;;  %468 = vmatpush.msra.mxu1 %v1907_v49 }
 0x31e   :  { %622 = vmatpush.msra.mxu2 %v1907_v49 }
 0x31f   :  { %315 = vmatpush.msra.mxu3 %v1912_v50  ;;  %469 = vmatpush.msra.mxu1 %v1912_v50 }
 0x320   :  { %623 = vmatpush.msra.mxu2 %v1912_v50 }
 0x321   :  { %400 = vmatpush.msrb.mxu3 %v1806_v35  ;;  %554 = vmatpush.msrb.mxu1 %v1806_v35 }
 0x323   :  { %401 = vmatpush.msrb.mxu3 %v1811_v36  ;;  %555 = vmatpush.msrb.mxu1 %v1811_v36 }
 0x325   :  { %402 = vmatpush.msrb.mxu3 %v1818_v37  ;;  %556 = vmatpush.msrb.mxu1 %v1818_v37 }
 0x327   :  { %403 = vmatpush.msrb.mxu3 %v1828_v39  ;;  %557 = vmatpush.msrb.mxu1 %v1828_v39 }
 0x329   :  { %404 = vmatpush.msrb.mxu3 %v1835_v40  ;;  %558 = vmatpush.msrb.mxu1 %v1835_v40 }
 0x32b   :  { %405 = vmatpush.msrb.mxu3 %v1842_v41  ;;  %559 = vmatpush.msrb.mxu1 %v1842_v41 }
 0x32d   :  { %406 = vmatpush.msrb.mxu3 %v1849_v42  ;;  %560 = vmatpush.msrb.mxu1 %v1849_v42 }
 0x32f   :  { %407 = vmatpush.msrb.mxu3 %v1860_v45  ;;  %561 = vmatpush.msrb.mxu1 %v1860_v45 }
 0x35e   :  { %v281_v17 = vpop.permute.xlu2 %280 }
 0x35f   :  { %v283_v19 = vmul.f32 %v281_v17, %v275_v18 }
 0x361   :  { %285 = vrot.lane.b32.xlu0 %v283_v19, %s1700_s27 }
 0x366   :  { %v367_v26 = vpop.permute.xlu2 %366 }
 0x367   :  { %v369_v27 = vmul.f32 %v367_v26, %v361_v25 }
 0x369   :  { %371 = vrot.lane.b32.xlu1 %v369_v27, %s1700_s27 }
 0x372   :  { %v134_v61 = vpop.f32.mrf.mxu0 }
 0x373   :  { %v135_v62 = vadd.f32 %v1794_v10, %v134_v61 }
 0x3d3   :  { %v286_v29 = vpop.permute.xlu0 %285 }
 0x3d4   :  { %v1890_v30 = vadd.f32 %v286_v29, %v278_v28 }
 0x3d6   :  { %1497 = vtanh.f32 %v1890_v30 }
 0x3db   :  { %v372_v32 = vpop.permute.xlu1 %371 }
 0x3dc   :  { %v1498_v34 = vpop.eup %1497  ;;  %v1894_v38 = vadd.f32 %v372_v32, %v364_v31 }
 0x3dd   :  { %291 = vrot.lane.b32.xlu2 %v1498_v34, %s1699_s26 }
 0x3de   :  { %1499 = vtanh.f32 %v1894_v38 }
 0x3e4   :  { %v1500_v43 = vpop.eup %1499 }
 0x3e5   :  { %377 = vrot.lane.b32.xlu0 %v1500_v43, %s1699_s26 }
 0x437   :  { %v292_v44 = vpop.permute.xlu2 %291 }
 0x438   :  { %v294_v46 = vmul.f32 %v292_v44, %v275_v18 }
 0x43a   :  { %385 = vrot.lane.b32.xlu0 %v294_v46, %s1699_s26  ;;  %296 = vrot.lane.b32.xlu1 %v294_v46, %s1700_s27 }
 0x457   :  { %v378_v51 = vpop.permute.xlu0 %377 }
 0x458   :  { %v380_v52 = vmul.f32 %v378_v51, %v361_v25 }
 0x45a   :  { %382 = vrot.lane.b32.xlu2 %v380_v52, %s1700_s27 }
 0x4ac   :  { %v297_v54 = vpop.permute.xlu1 %296  ;;  %v386_v55 = vpop.permute.xlu0 %385 }
 0x4ad   :  { %1430 = vmatmul.msk.f32.vlgmr.msra.gmra.mxu3 %vm86_vm0, %v297_v54 }
 0x4ae   :  { %643 = vmatpush.msra.mxu3 %v1765_v2 }
 0x4b0   :  { %644 = vmatpush.msra.mxu3 %v1768_v3 }
 0x4b2   :  { %645 = vmatpush.msra.mxu3 %v1773_v5 }
 0x4b4   :  { %v383_v56 = vpop.permute.xlu2 %382  ;;  %646 = vmatpush.msra.mxu3 %v1779_v7 }
 0x4b5   :  { %v388_v57 = vsel %vm86_vm0, %v383_v56, %v386_v55  ;;  %1436 = vmatmul.msk.f32.vlgmr.msrb.gmra.mxu2 %vm86_vm0, %v383_v56 }
 0x4b6   :  { %1433 = vmatmul.msk.f32.vlgmr.msrb.gmra.mxu3 %vm234_vm5, %v388_v57  ;;  %708 = vmatpush.msrb.mxu2 %v1806_v35 }
 0x4b7   :  { %774 = vmatpush.msrb.mxu3 %v1901_v47 }
 0x4b8   :  { %709 = vmatpush.msrb.mxu2 %v1811_v36 }
 0x4b9   :  { %775 = vmatpush.msrb.mxu3 %v1903_v33 }
 0x4ba   :  { %710 = vmatpush.msrb.mxu2 %v1818_v37 }
 0x4bb   :  { %776 = vmatpush.msrb.mxu3 %v1907_v49 }
 0x4bc   :  { %711 = vmatpush.msrb.mxu2 %v1828_v39 }
 0x4bd   :  { %777 = vmatpush.msrb.mxu3 %v1912_v50 }
 0x4be   :  { %712 = vmatpush.msrb.mxu2 %v1835_v40 }
 0x4c0   :  { %713 = vmatpush.msrb.mxu2 %v1842_v41 }
 0x4c2   :  { %714 = vmatpush.msrb.mxu2 %v1849_v42 }
 0x4c4   :  { %715 = vmatpush.msrb.mxu2 %v1860_v45 }
 0x530   :  { %v317_v59 = vpop.f32.mrf.mxu3 }
 0x531   :  { %v318_v60 = vadd.f32 %v1965_v58, %v317_v59 }
 0x533   :  { %320 = vst [vmem:[#allocation7] sm:$0xff] %v318_v60 }
 0x538   :  { %v494_v63 = vpop.f32.mrf.mxu2 }
 0x539   :  { %v497_v0 = vadd.f32 %v494_v63, %v135_v62  ;;  %v409_v1 = vpop.f32.mrf.mxu3 }
 0x53a   :  { %v410_v4 = vadd.f32 %v1882_v48, %v409_v1 }
 0x53b   :  { %1501 = vtanh.f32 %v497_v0  ;;  %v1437_v9 = vmul.f32 -1.442695, %v497_v0 }
 0x53c   :  { %1503 = vtanh.f32 %v410_v4  ;;  %v1434_v14 = vmul.f32 -1.442695, %v410_v4 }
 0x53d   :  { %1505 = vpow2.f32 %v1437_v9 }
 0x541   :  { %v1502_v6 = vpop.eup %1501 }
 0x542   :  { %v1504_v8 = vpop.eup %1503  ;;  %520 = vrot.lane.b32.xlu2 %v1502_v6, %s1699_s26 }
 0x543   :  { %434 = vrot.lane.b32.xlu1 %v1504_v8, %s1699_s26  ;;  %v1506_v11 = vpop.eup %1505 }
 0x544   :  { %v501_v12 = vadd.f32 1.0, %v1506_v11 }
 0x546   :  { %1507 = vrcp.f32 %v501_v12  ;;  %v513_v21 = vand.u32 2147483648, %v501_v12  ;;  %vm507_vm15 = vweird.f32 %v501_v12  ;;  %v511_v22 = vand.u32 2147483647, %v501_v12 }
 0x547   :  { %1509 = vpow2.f32 %v1434_v14 }
 0x548   :  { %v514_v24 = vor.u32 1.1754944e-38, %v513_v21  ;;  %vm512_vm2 = vcmp.eq.f32.partialorder %v511_v22, 8.507059e+37 }
 0x54c   :  { %v1508_v13 = vpop.eup %1507 }
 0x54d   :  { %v503_v15 = vmul.f32 %v1508_v13, %v501_v12  ;;  %v1510_v18 = vpop.eup %1509  ;;  %vm508_vm14 = vweird.f32 %v1508_v13 }
 0x54e   :  { %v415_v19 = vadd.f32 1.0, %v1510_v18  ;;  %vm509_vm1 = vmor %vm507_vm15, %vm508_vm14 }
 0x54f   :  { %v504_v16 = vsub.f32 1.0, %v503_v15 }
 0x550   :  { %1511 = vrcp.f32 %v415_v19  ;;  %v427_v43 = vand.u32 2147483648, %v415_v19  ;;  %vm421_vm4 = vweird.f32 %v415_v19  ;;  %v425_v44 = vand.u32 2147483647, %v415_v19 }
 0x551   :  { %v505_v17 = vmul.f32 %v1508_v13, %v504_v16 }
 0x552   :  { %v428_v51 = vor.u32 1.1754944e-38, %v427_v43  ;;  %vm426_vm7 = vcmp.eq.f32.partialorder %v425_v44, 8.507059e+37 }
 0x553   :  { %v506_v20 = vadd.f32 %v1508_v13, %v505_v17 }
 0x555   :  { %v510_v23 = vsel %vm509_vm1, %v1508_v13, %v506_v20 }
 0x556   :  { %v515_v26 = vsel %vm512_vm2, %v514_v24, %v510_v23  ;;  %v1512_v28 = vpop.eup %1511 }
 0x557   :  { %v417_v29 = vmul.f32 %v1512_v28, %v415_v19  ;;  %vm422_vm3 = vweird.f32 %v1512_v28  ;;  %v518_v55 = vmul.f32 %v515_v26, %v1894_v38 }
 0x558   :  { %vm423_vm6 = vmor %vm421_vm4, %vm422_vm3 }
 0x559   :  { %v418_v31 = vsub.f32 1.0, %v417_v29 }
 0x55b   :  { %v419_v32 = vmul.f32 %v1512_v28, %v418_v31 }
 0x55d   :  { %v420_v34 = vadd.f32 %v1512_v28, %v419_v32 }
 0x55f   :  { %v424_v46 = vsel %vm423_vm6, %v1512_v28, %v420_v34 }
 0x560   :  { %v429_v53 = vsel %vm426_vm7, %v428_v51, %v424_v46 }
 0x561   :  { %v432_v60 = vmul.f32 %v429_v53, %v1890_v30  ;;  %v73_v30 = vld [vmem:[%s2194_s0 + $0x18] sm:$0xff] }
 0x562   :  { %1422 = vmatmul.msk.f32.gmra.mxu0 %vm86_vm0, %v73_v30 }
 0x59c   :  { %v521_v25 = vpop.permute.xlu2 %520 }
 0x59d   :  { %v523_v27 = vmul.f32 %v521_v25, %v515_v26 }
 0x59f   :  { %525 = vrot.lane.b32.xlu1 %v523_v27, %s1700_s27 }
 0x5b5   :  { %v435_v52 = vpop.permute.xlu1 %434 }
 0x5b6   :  { %v437_v54 = vmul.f32 %v435_v52, %v429_v53 }
 0x5b8   :  { %439 = vrot.lane.b32.xlu0 %v437_v54, %s1700_s27 }
 0x5df   :  { %v137_v12 = vpop.f32.mrf.mxu0 }
 0x5e0   :  { %v138_v13 = vadd.f32 %v1794_v10, %v137_v12 }
 0x611   :  { %v526_v56 = vpop.permute.xlu1 %525 }
 0x612   :  { %v1975_v57 = vadd.f32 %v526_v56, %v518_v55 }
 0x614   :  { %1513 = vtanh.f32 %v1975_v57 }
 0x61a   :  { %v1514_v59 = vpop.eup %1513 }
 0x61b   :  { %531 = vrot.lane.b32.xlu0 %v1514_v59, %s1699_s26 }
 0x62a   :  { %v440_v61 = vpop.permute.xlu0 %439 }
 0x62b   :  { %v1980_v62 = vadd.f32 %v440_v61, %v432_v60 }
 0x62d   :  { %1515 = vtanh.f32 %v1980_v62 }
 0x633   :  { %v1516_v63 = vpop.eup %1515 }
 0x634   :  { %445 = vrot.lane.b32.xlu2 %v1516_v63, %s1699_s26 }
 0x68d   :  { %v532_v0 = vpop.permute.xlu0 %531 }
 0x68e   :  { %v534_v38 = vmul.f32 %v532_v0, %v515_v26  ;;  %v446_v1 = vpop.permute.xlu2 %445 }
 0x68f   :  { %v448_v4 = vmul.f32 %v446_v1, %v429_v53 }
 0x690   :  { %536 = vrot.lane.b32.xlu2 %v534_v38, %s1700_s27 }
 0x691   :  { %539 = vrot.lane.b32.xlu0 %v448_v4, %s1699_s26  ;;  %450 = vrot.lane.b32.xlu1 %v448_v4, %s1700_s27 }
 0x6ea   :  { %v537_v6 = vpop.permute.xlu2 %536 }
 0x6eb   :  { %1441 = vmatmul.msk.f32.vlgmr.msra.gmra.mxu3 %vm86_vm0, %v537_v6 }
 0x6ec   :  { %862 = vmatpush.msra.mxu3 %v1806_v35 }
 0x6ee   :  { %863 = vmatpush.msra.mxu3 %v1811_v36 }
 0x6f0   :  { %864 = vmatpush.msra.mxu3 %v1818_v37 }
 0x6f2   :  { %865 = vmatpush.msra.mxu3 %v1828_v39 }
 0x6f4   :  { %866 = vmatpush.msra.mxu3 %v1835_v40 }
 0x6f6   :  { %867 = vmatpush.msra.mxu3 %v1842_v41 }
 0x6f8   :  { %868 = vmatpush.msra.mxu3 %v1849_v42 }
 0x6fa   :  { %869 = vmatpush.msra.mxu3 %v1860_v45 }
 0x703   :  { %v451_v8 = vpop.permute.xlu1 %450  ;;  %v540_v9 = vpop.permute.xlu0 %539 }
 0x704   :  { %1435 = vmatmul.msk.f32.vlgmr.msra.gmra.mxu1 %vm86_vm0, %v451_v8  ;;  %v542_v11 = vsel %vm86_vm0, %v537_v6, %v540_v9 }
 0x705   :  { %797 = vmatpush.msra.mxu1 %v1765_v2 }
 0x707   :  { %798 = vmatpush.msra.mxu1 %v1768_v3 }
 0x709   :  { %799 = vmatpush.msra.mxu1 %v1773_v5 }
 0x70b   :  { %800 = vmatpush.msra.mxu1 %v1779_v7 }
 0x70c   :  { %1438 = vmatmul.msk.f32.vlgmr.msrb.gmra.mxu1 %vm234_vm5, %v542_v11 }
 0x70d   :  { %928 = vmatpush.msrb.mxu1 %v1901_v47 }
 0x70f   :  { %929 = vmatpush.msrb.mxu1 %v1903_v33 }
 0x711   :  { %930 = vmatpush.msrb.mxu1 %v1907_v49 }
 0x713   :  { %931 = vmatpush.msrb.mxu1 %v1912_v50 }
 0x76e   :  { %v648_v14 = vpop.f32.mrf.mxu3 }
 0x76f   :  { %v651_v15 = vadd.f32 %v648_v14, %v138_v13 }
 0x771   :  { %1517 = vtanh.f32 %v651_v15  ;;  %v1442_v22 = vmul.f32 -1.442695, %v651_v15 }
 0x777   :  { %v1518_v16 = vpop.eup %1517 }
 0x778   :  { %674 = vrot.lane.b32.xlu2 %v1518_v16, %s1699_s26 }
 0x781   :  { %v471_v17 = vpop.f32.mrf.mxu1 }
 0x782   :  { %v472_v18 = vadd.f32 %v1965_v58, %v471_v17 }
 0x784   :  { %474 = vst [vmem:[#allocation7 + $0x8] sm:$0xff] %v472_v18 }
 0x789   :  { %v563_v19 = vpop.f32.mrf.mxu1 }
 0x78a   :  { %v564_v20 = vadd.f32 %v1882_v48, %v563_v19 }
 0x78c   :  { %1519 = vtanh.f32 %v564_v20  ;;  %v1439_v52 = vmul.f32 -1.442695, %v564_v20 }
 0x78d   :  { %1521 = vpow2.f32 %v1442_v22 }
 0x792   :  { %v1520_v21 = vpop.eup %1519 }
 0x793   :  { %588 = vrot.lane.b32.xlu1 %v1520_v21, %s1699_s26  ;;  %v1522_v23 = vpop.eup %1521 }
 0x794   :  { %v655_v24 = vadd.f32 1.0, %v1522_v23 }
 0x796   :  { %1523 = vrcp.f32 %v655_v24  ;;  %v667_v31 = vand.u32 2147483648, %v655_v24  ;;  %vm661_vm9 = vweird.f32 %v655_v24  ;;  %v665_v32 = vand.u32 2147483647, %v655_v24 }
 0x797   :  { %1525 = vpow2.f32 %v1439_v52 }
 0x798   :  { %v668_v43 = vor.u32 1.1754944e-38, %v667_v31  ;;  %vm666_vm11 = vcmp.eq.f32.partialorder %v665_v32, 8.507059e+37 }
 0x79c   :  { %v1524_v25 = vpop.eup %1523 }
 0x79d   :  { %v657_v26 = vmul.f32 %v1524_v25, %v655_v24  ;;  %vm662_vm8 = vweird.f32 %v1524_v25  ;;  %v1526_v53 = vpop.eup %1525 }
 0x79e   :  { %vm663_vm10 = vmor %vm661_vm9, %vm662_vm8  ;;  %v569_v54 = vadd.f32 1.0, %v1526_v53 }
 0x79f   :  { %v658_v27 = vsub.f32 1.0, %v657_v26 }
 0x7a0   :  { %1527 = vrcp.f32 %v569_v54  ;;  %v581_v63 = vand.u32 2147483648, %v569_v54  ;;  %vm575_vm13 = vweird.f32 %v569_v54  ;;  %v579_v0 = vand.u32 2147483647, %v569_v54 }
 0x7a1   :  { %v659_v28 = vmul.f32 %v1524_v25, %v658_v27 }
 0x7a2   :  { %v582_v1 = vor.u32 1.1754944e-38, %v581_v63  ;;  %vm580_vm15 = vcmp.eq.f32.partialorder %v579_v0, 8.507059e+37 }
 0x7a3   :  { %v660_v29 = vadd.f32 %v1524_v25, %v659_v28 }
 0x7a5   :  { %v664_v34 = vsel %vm663_vm10, %v1524_v25, %v660_v29 }
 0x7a6   :  { %v669_v46 = vsel %vm666_vm11, %v668_v43, %v664_v34  ;;  %v1528_v55 = vpop.eup %1527 }
 0x7a7   :  { %v571_v56 = vmul.f32 %v1528_v55, %v569_v54  ;;  %vm576_vm12 = vweird.f32 %v1528_v55  ;;  %v672_v8 = vmul.f32 %v669_v46, %v1975_v57  ;;  %v74_v57 = vld [vmem:[%s2194_s0 + $0x20] sm:$0xff] }
 0x7a8   :  { %vm577_vm14 = vmor %vm575_vm13, %vm576_vm12  ;;  %1423 = vmatmul.msk.f32.gmra.mxu0 %vm86_vm0, %v74_v57 }
 0x7a9   :  { %v572_v59 = vsub.f32 1.0, %v571_v56 }
 0x7ab   :  { %v573_v60 = vmul.f32 %v1528_v55, %v572_v59 }
 0x7ad   :  { %v574_v61 = vadd.f32 %v1528_v55, %v573_v60 }
 0x7af   :  { %v578_v38 = vsel %vm577_vm14, %v1528_v55, %v574_v61 }
 0x7b0   :  { %v583_v30 = vsel %vm580_vm15, %v582_v1, %v578_v38 }
 0x7b1   :  { %v586_v13 = vmul.f32 %v583_v30, %v1980_v62 }
 0x7d2   :  { %v675_v44 = vpop.permute.xlu2 %674 }
 0x7d3   :  { %v677_v51 = vmul.f32 %v675_v44, %v669_v46 }
 0x7d5   :  { %679 = vrot.lane.b32.xlu1 %v677_v51, %s1700_s27 }
 0x805   :  { %v589_v4 = vpop.permute.xlu1 %588 }
 0x806   :  { %v591_v6 = vmul.f32 %v589_v4, %v583_v30 }
 0x808   :  { %593 = vrot.lane.b32.xlu0 %v591_v6, %s1700_s27 }
 0x847   :  { %v680_v9 = vpop.permute.xlu1 %679 }
 0x848   :  { %v2019_v11 = vadd.f32 %v680_v9, %v672_v8 }
 0x84a   :  { %1529 = vtanh.f32 %v2019_v11 }
 0x850   :  { %v1530_v12 = vpop.eup %1529 }
 0x851   :  { %685 = vrot.lane.b32.xlu0 %v1530_v12, %s1699_s26 }
 0x87a   :  { %v594_v14 = vpop.permute.xlu0 %593 }
 0x87b   :  { %v2024_v15 = vadd.f32 %v594_v14, %v586_v13 }
 0x87d   :  { %1531 = vtanh.f32 %v2024_v15 }
 0x883   :  { %v1532_v16 = vpop.eup %1531 }
 0x884   :  { %599 = vrot.lane.b32.xlu2 %v1532_v16, %s1699_s26 }
 0x8c3   :  { %v686_v17 = vpop.permute.xlu0 %685 }
 0x8c4   :  { %v688_v18 = vmul.f32 %v686_v17, %v669_v46 }
 0x8c6   :  { %690 = vrot.lane.b32.xlu2 %v688_v18, %s1700_s27 }
 0x8de   :  { %v600_v19 = vpop.permute.xlu2 %599 }
 0x8df   :  { %v602_v62 = vmul.f32 %v600_v19, %v583_v30 }
 0x8e1   :  { %693 = vrot.lane.b32.xlu0 %v602_v62, %s1699_s26  ;;  %604 = vrot.lane.b32.xlu1 %v602_v62, %s1700_s27 }
 0x920   :  { %v691_v20 = vpop.permute.xlu2 %690 }
 0x921   :  { %1446 = vmatmul.msk.f32.vlgmr.msra.gmra.mxu1 %vm86_vm0, %v691_v20 }
 0x922   :  { %1082 = vmatpush.msra.mxu1 %v1901_v47  ;;  %v140_v47 = vpop.f32.mrf.mxu0 }
 0x924   :  { %1083 = vmatpush.msra.mxu1 %v1903_v33  ;;  %v141_v33 = vadd.f32 %v1794_v10, %v140_v47  ;;  %v1605_v47 = vld [vmem:[#allocation2 + $0x18] sm:$0xff] }
 0x926   :  { %1084 = vmatpush.msra.mxu1 %v1907_v49 }
 0x928   :  { %1085 = vmatpush.msra.mxu1 %v1912_v50 }
 0x953   :  { %v605_v21 = vpop.permute.xlu1 %604  ;;  %v694_v22 = vpop.permute.xlu0 %693 }
 0x954   :  { %1440 = vmatmul.msk.f32.vlgmr.msra.gmra.mxu2 %vm86_vm0, %v605_v21  ;;  %v696_v23 = vsel %vm86_vm0, %v691_v20, %v694_v22  ;;  %v75_v21 = vld [vmem:[%s2194_s0 + $0x28] sm:$0xff] }
 0x955   :  { %951 = vmatpush.msra.mxu2 %v1765_v2  ;;  %1424 = vmatmul.msk.f32.gmra.mxu0 %vm86_vm0, %v75_v21 }
 0x957   :  { %952 = vmatpush.msra.mxu2 %v1768_v3 }
 0x959   :  { %953 = vmatpush.msra.mxu2 %v1773_v5 }
 0x95b   :  { %954 = vmatpush.msra.mxu2 %v1779_v7 }
 0x95c   :  { %1443 = vmatmul.msk.f32.vlgmr.msrb.gmra.mxu2 %vm234_vm5, %v696_v23 }
 0x95d   :  { %1105 = vmatpush.msrb.mxu2 %v1765_v2 }
 0x95f   :  { %1106 = vmatpush.msrb.mxu2 %v1768_v3 }
 0x961   :  { %1107 = vmatpush.msrb.mxu2 %v1773_v5 }
 0x963   :  { %1108 = vmatpush.msrb.mxu2 %v1779_v7 }
 0x99e   :  { %v802_v49 = vpop.f32.mrf.mxu1 }
 0x99f   :  { %v805_v50 = vadd.f32 %v802_v49, %v141_v33  ;;  %v1606_v33 = vld [vmem:[#allocation2 + $0x10] sm:$0xff]  ;;  %v1607_v49 = vld [vmem:[#allocation2 + $0x8] sm:$0xff] }
 0x9a1   :  { %1533 = vtanh.f32 %v805_v50  ;;  %v1447_v25 = vmul.f32 -1.442695, %v805_v50  ;;  %v1608_v50 = vld [vmem:[#allocation2] sm:$0xff] }
 0x9a3   :  { %1535 = vpow2.f32 %v1447_v25 }
 0x9a7   :  { %v1534_v24 = vpop.eup %1533 }
 0x9a8   :  { %828 = vrot.lane.b32.xlu2 %v1534_v24, %s1699_s26 }
 0x9a9   :  { %v1536_v2 = vpop.eup %1535 }
 0x9aa   :  { %v809_v7 = vadd.f32 1.0, %v1536_v2 }
 0x9ac   :  { %v821_v43 = vand.u32 2147483648, %v809_v7  ;;  %vm815_vm2 = vweird.f32 %v809_v7  ;;  %v819_v44 = vand.u32 2147483647, %v809_v7 }
 0x9ae   :  { %v822_v51 = vor.u32 1.1754944e-38, %v821_v43  ;;  %vm820_vm4 = vcmp.eq.f32.partialorder %v819_v44, 8.507059e+37 }
 0x9d7   :  { %v625_v26 = vpop.f32.mrf.mxu2 }
 0x9d8   :  { %v626_v27 = vadd.f32 %v1965_v58, %v625_v26 }
 0x9da   :  { %628 = vst [vmem:[#allocation7 + $0x10] sm:$0xff] %v626_v27 }
 0x9df   :  { %v717_v3 = vpop.f32.mrf.mxu2 }
 0x9e0   :  { %v718_v5 = vadd.f32 %v1882_v48, %v717_v3 }
 0x9e2   :  { %1537 = vtanh.f32 %v718_v5  ;;  %v1444_v55 = vmul.f32 -1.442695, %v718_v5 }
 0x9e3   :  { %1539 = vrcp.f32 %v809_v7 }
 0x9e4   :  { %1541 = vpow2.f32 %v1444_v55 }
 0x9e8   :  { %v1538_v10 = vpop.eup %1537 }
 0x9e9   :  { %742 = vrot.lane.b32.xlu1 %v1538_v10, %s1699_s26  ;;  %v1540_v28 = vpop.eup %1539 }
 0x9ea   :  { %v811_v29 = vmul.f32 %v1540_v28, %v809_v7  ;;  %vm816_vm1 = vweird.f32 %v1540_v28  ;;  %v1542_v56 = vpop.eup %1541 }
 0x9eb   :  { %vm817_vm3 = vmor %vm815_vm2, %vm816_vm1  ;;  %v723_v59 = vadd.f32 1.0, %v1542_v56 }
 0x9ec   :  { %v812_v31 = vsub.f32 1.0, %v811_v29 }
 0x9ed   :  { %1543 = vrcp.f32 %v723_v59  ;;  %v735_v1 = vand.u32 2147483648, %v723_v59  ;;  %vm729_vm7 = vweird.f32 %v723_v59  ;;  %v733_v4 = vand.u32 2147483647, %v723_v59 }
 0x9ee   :  { %v813_v32 = vmul.f32 %v1540_v28, %v812_v31 }
 0x9ef   :  { %v736_v6 = vor.u32 1.1754944e-38, %v735_v1  ;;  %vm734_vm9 = vcmp.eq.f32.partialorder %v733_v4, 8.507059e+37 }
 0x9f0   :  { %v814_v34 = vadd.f32 %v1540_v28, %v813_v32 }
 0x9f2   :  { %v818_v46 = vsel %vm817_vm3, %v1540_v28, %v814_v34 }
 0x9f3   :  { %v823_v53 = vsel %vm820_vm4, %v822_v51, %v818_v46  ;;  %v1544_v60 = vpop.eup %1543 }
 0x9f4   :  { %v725_v61 = vmul.f32 %v1544_v60, %v723_v59  ;;  %vm730_vm6 = vweird.f32 %v1544_v60  ;;  %v826_v13 = vmul.f32 %v823_v53, %v2019_v11 }
 0x9f5   :  { %vm731_vm8 = vmor %vm729_vm7, %vm730_vm6 }
 0x9f6   :  { %v726_v63 = vsub.f32 1.0, %v725_v61 }
 0x9f8   :  { %v727_v0 = vmul.f32 %v1544_v60, %v726_v63 }
 0x9fa   :  { %v728_v38 = vadd.f32 %v1544_v60, %v727_v0 }
 0x9fc   :  { %v732_v30 = vsel %vm731_vm8, %v1544_v60, %v728_v38 }
 0x9fd   :  { %v737_v9 = vsel %vm734_vm9, %v736_v6, %v732_v30 }
 0x9fe   :  { %v740_v17 = vmul.f32 %v737_v9, %v2024_v15 }
 0xa02   :  { %v829_v52 = vpop.permute.xlu2 %828 }
 0xa03   :  { %v831_v54 = vmul.f32 %v829_v52, %v823_v53 }
 0xa05   :  { %833 = vrot.lane.b32.xlu1 %v831_v54, %s1700_s27 }
 0xa5b   :  { %v743_v8 = vpop.permute.xlu1 %742 }
 0xa5c   :  { %v745_v12 = vmul.f32 %v743_v8, %v737_v9 }
 0xa5e   :  { %747 = vrot.lane.b32.xlu0 %v745_v12, %s1700_s27 }
 0xa77   :  { %v834_v14 = vpop.permute.xlu1 %833 }
 0xa78   :  { %v2059_v16 = vadd.f32 %v834_v14, %v826_v13 }
 0xa7a   :  { %1545 = vtanh.f32 %v2059_v16 }
 0xa80   :  { %v1546_v57 = vpop.eup %1545 }
 0xa81   :  { %839 = vrot.lane.b32.xlu0 %v1546_v57, %s1699_s26 }
 0xad0   :  { %v748_v18 = vpop.permute.xlu0 %747 }
 0xad1   :  { %v2064_v19 = vadd.f32 %v748_v18, %v740_v17 }
 0xad3   :  { %1547 = vtanh.f32 %v2064_v19 }
 0xad9   :  { %v1548_v62 = vpop.eup %1547 }
 0xada   :  { %753 = vrot.lane.b32.xlu2 %v1548_v62, %s1699_s26 }
 0xaf3   :  { %v840_v20 = vpop.permute.xlu0 %839 }
 0xaf4   :  { %v842_v11 = vmul.f32 %v840_v20, %v823_v53 }
 0xaf6   :  { %844 = vrot.lane.b32.xlu2 %v842_v11, %s1700_s27  ;;  %v76_v11 = vld [vmem:[%s2194_s0 + $0x30] sm:$0xff] }
 0xaf7   :  { %1425 = vmatmul.msk.f32.gmra.mxu0 %vm86_vm0, %v76_v11 }
 0xb34   :  { %v754_v22 = vpop.permute.xlu2 %753 }
 0xb35   :  { %v756_v15 = vmul.f32 %v754_v22, %v737_v9 }
 0xb37   :  { %847 = vrot.lane.b32.xlu0 %v756_v15, %s1699_s26  ;;  %758 = vrot.lane.b32.xlu1 %v756_v15, %s1700_s27 }
 0xb50   :  { %v845_v23 = vpop.permute.xlu2 %844 }
 0xb51   :  { %1451 = vmatmul.msk.f32.vlgmr.msra.gmra.mxu2 %vm86_vm0, %v845_v23 }
 0xb52   :  { %1259 = vmatpush.msra.mxu2 %v1605_v47 }
 0xb54   :  { %1260 = vmatpush.msra.mxu2 %v1606_v33 }
 0xb56   :  { %1261 = vmatpush.msra.mxu2 %v1607_v49 }
 0xb58   :  { %1262 = vmatpush.msra.mxu2 %v1608_v50 }
 0xba9   :  { %v759_v24 = vpop.permute.xlu1 %758  ;;  %v848_v25 = vpop.permute.xlu0 %847 }
 0xbaa   :  { %1445 = vmatmul.msk.f32.vlgmr.msrb.gmra.mxu3 %vm86_vm0, %v759_v24  ;;  %v850_v26 = vsel %vm86_vm0, %v845_v23, %v848_v25 }
 0xbab   :  { %1170 = vmatpush.msrb.mxu3 %v1806_v35  ;;  %v143_v35 = vpop.f32.mrf.mxu0 }
 0xbad   :  { %1171 = vmatpush.msrb.mxu3 %v1811_v36  ;;  %v2090_v36 = vld [vmem:[%s2197_s3] ss:$0 sm:$0xff] }
 0xbaf   :  { %1172 = vmatpush.msrb.mxu3 %v1818_v37  ;;  %v144_v37 = vadd.f32 %v2090_v36, %v143_v35 }
 0xbb1   :  { %1173 = vmatpush.msrb.mxu3 %v1828_v39 }
 0xbb2   :  { %1448 = vmatmul.msk.f32.vlgmr.msra.gmra.mxu3 %vm234_vm5, %v850_v26 }
 0xbb3   :  { %1174 = vmatpush.msrb.mxu3 %v1835_v40  ;;  %v146_v33 = vpop.f32.mrf.mxu0 }
 0xbb4   :  { %v147_v49 = vadd.f32 %v2090_v36, %v146_v33 }
 0xbb5   :  { %1175 = vmatpush.msrb.mxu3 %v1842_v41 }
 0xbb7   :  { %1176 = vmatpush.msrb.mxu3 %v1849_v42 }
 0xbb9   :  { %1177 = vmatpush.msrb.mxu3 %v1860_v45 }
 0xbd4   :  { %v956_v27 = vpop.f32.mrf.mxu2 }
 0xbd5   :  { %v959_v39 = vadd.f32 %v956_v27, %v144_v37  ;;  %v2132_v37 = vld [vmem:[%s2199_s5] ss:$0 sm:$0xff] }
 0xbd7   :  { %1549 = vtanh.f32 %v959_v39  ;;  %v1452_v40 = vmul.f32 -1.442695, %v959_v39 }
 0xbd9   :  { %1551 = vpow2.f32 %v1452_v40 }
 0xbdd   :  { %v1550_v2 = vpop.eup %1549 }
 0xbde   :  { %982 = vrot.lane.b32.xlu1 %v1550_v2, %s1699_s26 }
 0xbdf   :  { %v1552_v41 = vpop.eup %1551 }
 0xbe0   :  { %v963_v3 = vadd.f32 1.0, %v1552_v41 }
 0xbe2   :  { %1553 = vrcp.f32 %v963_v3  ;;  %v975_v43 = vand.u32 2147483648, %v963_v3  ;;  %vm969_vm11 = vweird.f32 %v963_v3  ;;  %v973_v44 = vand.u32 2147483647, %v963_v3 }
 0xbe4   :  { %v976_v46 = vor.u32 1.1754944e-38, %v975_v43  ;;  %vm974_vm13 = vcmp.eq.f32.partialorder %v973_v44, 8.507059e+37 }
 0xbe8   :  { %v1554_v10 = vpop.eup %1553 }
 0xbe9   :  { %v965_v28 = vmul.f32 %v1554_v10, %v963_v3  ;;  %vm970_vm10 = vweird.f32 %v1554_v10 }
 0xbea   :  { %vm971_vm12 = vmor %vm969_vm11, %vm970_vm10 }
 0xbeb   :  { %v966_v31 = vsub.f32 1.0, %v965_v28 }
 0xbed   :  { %v967_v32 = vmul.f32 %v1554_v10, %v966_v31 }
 0xbef   :  { %v968_v34 = vadd.f32 %v1554_v10, %v967_v32 }
 0xc2d   :  { %v779_v42 = vpop.f32.mrf.mxu3 }
 0xc2e   :  { %v780_v45 = vadd.f32 %v1965_v58, %v779_v42  ;;  %v972_v58 = vsel %vm971_vm12, %v1554_v10, %v968_v34 }
 0xc2f   :  { %v977_v52 = vsel %vm974_vm13, %v976_v46, %v972_v58 }
 0xc30   :  { %782 = vst [vmem:[#allocation7 + $0x18] sm:$0xff] %v780_v45  ;;  %v980_v9 = vmul.f32 %v977_v52, %v2059_v16 }
 0xc35   :  { %v871_v5 = vpop.f32.mrf.mxu3 }
 0xc36   :  { %v872_v7 = vadd.f32 %v1882_v48, %v871_v5 }
 0xc38   :  { %1555 = vtanh.f32 %v872_v7  ;;  %v1449_v53 = vmul.f32 -1.442695, %v872_v7 }
 0xc3a   :  { %1557 = vpow2.f32 %v1449_v53 }
 0xc3e   :  { %v1556_v29 = vpop.eup %1555 }
 0xc3f   :  { %896 = vrot.lane.b32.xlu2 %v1556_v29, %s1699_s26 }
 0xc40   :  { %v1558_v54 = vpop.eup %1557 }
 0xc41   :  { %v877_v55 = vadd.f32 1.0, %v1558_v54 }
 0xc43   :  { %1559 = vrcp.f32 %v877_v55  ;;  %v889_v0 = vand.u32 2147483648, %v877_v55  ;;  %vm883_vm15 = vweird.f32 %v877_v55  ;;  %v887_v38 = vand.u32 2147483647, %v877_v55 }
 0xc45   :  { %v890_v4 = vor.u32 1.1754944e-38, %v889_v0  ;;  %vm888_vm2 = vcmp.eq.f32.partialorder %v887_v38, 8.507059e+37 }
 0xc49   :  { %v1560_v56 = vpop.eup %1559 }
 0xc4a   :  { %v879_v59 = vmul.f32 %v1560_v56, %v877_v55  ;;  %vm884_vm14 = vweird.f32 %v1560_v56 }
 0xc4b   :  { %vm885_vm1 = vmor %vm883_vm15, %vm884_vm14 }
 0xc4c   :  { %v880_v60 = vsub.f32 1.0, %v879_v59 }
 0xc4e   :  { %v881_v61 = vmul.f32 %v1560_v56, %v880_v60 }
 0xc50   :  { %v983_v51 = vpop.permute.xlu1 %982  ;;  %v882_v63 = vadd.f32 %v1560_v56, %v881_v61 }
 0xc51   :  { %v985_v48 = vmul.f32 %v983_v51, %v977_v52 }
 0xc52   :  { %v886_v1 = vsel %vm885_vm1, %v1560_v56, %v882_v63 }
 0xc53   :  { %987 = vrot.lane.b32.xlu0 %v985_v48, %s1700_s27  ;;  %v891_v6 = vsel %vm888_vm2, %v890_v4, %v886_v1 }
 0xc54   :  { %v894_v57 = vmul.f32 %v891_v6, %v2064_v19  ;;  %v77_v19 = vld [vmem:[%s2194_s0 + $0x38] sm:$0xff] }
 0xc55   :  { %1426 = vmatmul.msk.f32.gmra.mxu0 %vm86_vm0, %v77_v19 }
 0xc99   :  { %v897_v30 = vpop.permute.xlu2 %896 }
 0xc9a   :  { %v899_v8 = vmul.f32 %v897_v30, %v891_v6 }
 0xc9c   :  { %901 = vrot.lane.b32.xlu1 %v899_v8, %s1700_s27 }
 0xcc5   :  { %v988_v12 = vpop.permute.xlu0 %987 }
 0xcc6   :  { %v2100_v13 = vadd.f32 %v988_v12, %v980_v9 }
 0xcc8   :  { %1561 = vtanh.f32 %v2100_v13 }
 0xcce   :  { %v1562_v14 = vpop.eup %1561 }
 0xccf   :  { %993 = vrot.lane.b32.xlu2 %v1562_v14, %s1699_s26 }
 0xcd2   :  { %v2127_v26 = vpop.f32.mrf.mxu0 }
 0xd0e   :  { %v902_v17 = vpop.permute.xlu1 %901 }
 0xd0f   :  { %v2105_v18 = vadd.f32 %v902_v17, %v894_v57 }
 0xd11   :  { %1563 = vtanh.f32 %v2105_v18 }
 0xd17   :  { %v1564_v62 = vpop.eup %1563 }
 0xd18   :  { %907 = vrot.lane.b32.xlu0 %v1564_v62, %s1699_s26 }
 0xd29   :  { %v994_v20 = vpop.permute.xlu2 %993 }
 0xd2a   :  { %v996_v16 = vmul.f32 %v994_v20, %v977_v52 }
 0xd2c   :  { %998 = vrot.lane.b32.xlu1 %v996_v16, %s1700_s27  ;;  %v150_v16 = vadd.f32 %v2090_v36, %v2127_v26 }
 0xd8a   :  { %v908_v21 = vpop.permute.xlu0 %907 }
 0xd8b   :  { %v2118_v22 = vmul.f32 %v908_v21, %v891_v6 }
 0xd8d   :  { %1001 = vrot.lane.b32.xlu2 %v2118_v22, %s1699_s26 }
 0xd9e   :  { %v999_v15 = vpop.permute.xlu1 %998 }
 0xd9f   :  { %1456 = vmatmul.msk.f32.vlgmr.msrb.gmra.mxu2 %vm86_vm0, %v999_v15 }
 0xde7   :  { %v1002_v23 = vpop.permute.xlu2 %1001 }
 0xde8   :  { %v1004_v47 = vsel %vm86_vm0, %v999_v15, %v1002_v23 }
 0xde9   :  { %1453 = vmatmul.msk.f32.vlgmr.msrb.gmra.mxu0 %vm234_vm5, %v1004_v47 }
 0xe22   :  { %v1110_v50 = vpop.f32.mrf.mxu2 }
 0xe23   :  { %v1113_v24 = vadd.f32 %v1110_v50, %v147_v49 }
 0xe25   :  { %1565 = vtanh.f32 %v1113_v24  ;;  %v1457_v2 = vmul.f32 -1.442695, %v1113_v24 }
 0xe2b   :  { %v1566_v25 = vpop.eup %1565 }
 0xe2c   :  { %1136 = vrot.lane.b32.xlu1 %v1566_v25, %s1699_s26 }
 0xe66   :  { %v1025_v35 = vpop.f32.mrf.mxu0 }
 0xe67   :  { %v1026_v27 = vadd.f32 %v2132_v37, %v1025_v35 }
 0xe69   :  { %1567 = vtanh.f32 %v1026_v27  ;;  %v1454_v44 = vmul.f32 -1.442695, %v1026_v27 }
 0xe6a   :  { %1569 = vpow2.f32 %v1457_v2 }
 0xe6f   :  { %v1568_v39 = vpop.eup %1567 }
 0xe70   :  { %1050 = vrot.lane.b32.xlu0 %v1568_v39, %s1699_s26  ;;  %v1570_v40 = vpop.eup %1569 }
 0xe71   :  { %v1117_v41 = vadd.f32 1.0, %v1570_v40 }
 0xe73   :  { %1571 = vrcp.f32 %v1117_v41  ;;  %v1129_v10 = vand.u32 2147483648, %v1117_v41  ;;  %vm1123_vm4 = vweird.f32 %v1117_v41  ;;  %v1127_v28 = vand.u32 2147483647, %v1117_v41 }
 0xe74   :  { %1573 = vpow2.f32 %v1454_v44 }
 0xe75   :  { %v1130_v31 = vor.u32 1.1754944e-38, %v1129_v10  ;;  %vm1128_vm7 = vcmp.eq.f32.partialorder %v1127_v28, 8.507059e+37 }
 0xe79   :  { %v1572_v42 = vpop.eup %1571 }
 0xe7a   :  { %v1119_v45 = vmul.f32 %v1572_v42, %v1117_v41  ;;  %vm1124_vm3 = vweird.f32 %v1572_v42  ;;  %v1574_v58 = vpop.eup %1573 }
 0xe7b   :  { %vm1125_vm6 = vmor %vm1123_vm4, %vm1124_vm3  ;;  %v1031_v46 = vadd.f32 1.0, %v1574_v58 }
 0xe7c   :  { %v1120_v3 = vsub.f32 1.0, %v1119_v45 }
 0xe7d   :  { %1575 = vrcp.f32 %v1031_v46  ;;  %v1043_v55 = vand.u32 2147483648, %v1031_v46  ;;  %vm1037_vm9 = vweird.f32 %v1031_v46  ;;  %v1041_v56 = vand.u32 2147483647, %v1031_v46 }
 0xe7e   :  { %v1121_v5 = vmul.f32 %v1572_v42, %v1120_v3 }
 0xe7f   :  { %v1044_v60 = vor.u32 1.1754944e-38, %v1043_v55  ;;  %vm1042_vm11 = vcmp.eq.f32.partialorder %v1041_v56, 8.507059e+37 }
 0xe80   :  { %v1122_v7 = vadd.f32 %v1572_v42, %v1121_v5 }
 0xe82   :  { %v1126_v29 = vsel %vm1125_vm6, %v1572_v42, %v1122_v7 }
 0xe83   :  { %v1131_v34 = vsel %vm1128_vm7, %v1130_v31, %v1126_v29  ;;  %v1576_v51 = vpop.eup %1575 }
 0xe84   :  { %v1033_v52 = vmul.f32 %v1576_v51, %v1031_v46  ;;  %vm1038_vm8 = vweird.f32 %v1576_v51  ;;  %v1134_v38 = vmul.f32 %v1131_v34, %v2100_v13 }
 0xe85   :  { %vm1039_vm10 = vmor %vm1037_vm9, %vm1038_vm8 }
 0xe86   :  { %v1034_v48 = vsub.f32 1.0, %v1033_v52 }
 0xe88   :  { %v1035_v53 = vmul.f32 %v1576_v51, %v1034_v48 }
 0xe8a   :  { %v1036_v54 = vadd.f32 %v1576_v51, %v1035_v53 }
 0xe8c   :  { %v1040_v59 = vsel %vm1039_vm10, %v1576_v51, %v1036_v54 }
 0xe8d   :  { %v1045_v63 = vsel %vm1042_vm11, %v1044_v60, %v1040_v59 }
 0xe8e   :  { %v1048_v6 = vmul.f32 %v1045_v63, %v2105_v18 }
 0xe9e   :  { %v1137_v32 = vpop.permute.xlu1 %1136 }
 0xe9f   :  { %v1139_v43 = vmul.f32 %v1137_v32, %v1131_v34 }
 0xea1   :  { %1141 = vrot.lane.b32.xlu0 %v1139_v43, %s1700_s27 }
 0xee2   :  { %v1051_v61 = vpop.permute.xlu0 %1050 }
 0xee3   :  { %v1053_v0 = vmul.f32 %v1051_v61, %v1045_v63 }
 0xee5   :  { %1055 = vrot.lane.b32.xlu2 %v1053_v0, %s1700_s27 }
 0xf13   :  { %v1142_v1 = vpop.permute.xlu0 %1141 }
 0xf14   :  { %v2139_v4 = vadd.f32 %v1142_v1, %v1134_v38 }
 0xf16   :  { %1577 = vtanh.f32 %v2139_v4 }
 0xf1c   :  { %v1578_v30 = vpop.eup %1577 }
 0xf1d   :  { %1147 = vrot.lane.b32.xlu2 %v1578_v30, %s1699_s26 }
 0xf3f   :  { %v1056_v8 = vpop.permute.xlu2 %1055 }
 0xf40   :  { %v2144_v9 = vadd.f32 %v1056_v8, %v1048_v6 }
 0xf42   :  { %1579 = vtanh.f32 %v2144_v9 }
 0xf48   :  { %v1580_v12 = vpop.eup %1579 }
 0xf49   :  { %1061 = vrot.lane.b32.xlu1 %v1580_v12, %s1699_s26 }
 0xf77   :  { %v1148_v14 = vpop.permute.xlu2 %1147 }
 0xf78   :  { %v1150_v13 = vmul.f32 %v1148_v14, %v1131_v34 }
 0xf7a   :  { %1152 = vrot.lane.b32.xlu0 %v1150_v13, %s1700_s27 }
 0xfbb   :  { %v1062_v57 = vpop.permute.xlu1 %1061 }
 0xfbc   :  { %v2149_v17 = vmul.f32 %v1062_v57, %v1045_v63 }
 0xfbe   :  { %1155 = vrot.lane.b32.xlu1 %v2149_v17, %s1699_s26 }
 0xfec   :  { %v1153_v62 = vpop.permute.xlu0 %1152 }
 0xfed   :  { %1461 = vmatmul.msk.f32.vlgmr.msra.gmra.mxu2 %vm86_vm0, %v1153_v62 }
0x1030   :  { %v1156_v18 = vpop.permute.xlu1 %1155 }
0x1031   :  { %v1158_v20 = vsel %vm86_vm0, %v1153_v62, %v1156_v18 }
0x1032   :  { %1458 = vmatmul.msk.f32.vlgmr.msrb.gmra.mxu3 %vm234_vm5, %v1158_v20 }
0x1070   :  { %v1264_v11 = vpop.f32.mrf.mxu2 }
0x1071   :  { %v1267_v19 = vadd.f32 %v1264_v11, %v150_v16 }
0x1073   :  { %1581 = vtanh.f32 %v1267_v19  ;;  %v1462_v33 = vmul.f32 -1.442695, %v1267_v19 }
0x1079   :  { %v1582_v21 = vpop.eup %1581 }
0x107a   :  { %1290 = vrot.lane.b32.xlu0 %v1582_v21, %s1699_s26 }
0x10b5   :  { %v1179_v15 = vpop.f32.mrf.mxu3 }
0x10b6   :  { %v1180_v23 = vadd.f32 %v2132_v37, %v1179_v15 }
0x10b8   :  { %1583 = vtanh.f32 %v1180_v23  ;;  %v1459_v41 = vmul.f32 -1.442695, %v1180_v23 }
0x10b9   :  { %1585 = vpow2.f32 %v1462_v33 }
0x10be   :  { %v1584_v47 = vpop.eup %1583 }
0x10bf   :  { %1204 = vrot.lane.b32.xlu2 %v1584_v47, %s1699_s26  ;;  %v1586_v49 = vpop.eup %1585 }
0x10c0   :  { %v1271_v50 = vadd.f32 1.0, %v1586_v49  ;;  %v1611_v49 = vld [vmem:[#allocation5 + $0x18] sm:$0xff] }
0x10c2   :  { %1587 = vrcp.f32 %v1271_v50  ;;  %v1283_v27 = vand.u32 2147483648, %v1271_v50  ;;  %vm1277_vm13 = vweird.f32 %v1271_v50  ;;  %v1281_v39 = vand.u32 2147483647, %v1271_v50 }
0x10c3   :  { %1589 = vpow2.f32 %v1459_v41 }
0x10c4   :  { %v1284_v40 = vor.u32 1.1754944e-38, %v1283_v27  ;;  %vm1282_vm15 = vcmp.eq.f32.partialorder %v1281_v39, 8.507059e+37 }
0x10c8   :  { %v1588_v24 = vpop.eup %1587 }
0x10c9   :  { %v1273_v36 = vmul.f32 %v1588_v24, %v1271_v50  ;;  %vm1278_vm12 = vweird.f32 %v1588_v24  ;;  %v1590_v5 = vpop.eup %1589  ;;  %v1612_v50 = vld [vmem:[#allocation5 + $0x10] sm:$0xff] }
0x10ca   :  { %vm1279_vm14 = vmor %vm1277_vm13, %vm1278_vm12  ;;  %v1185_v7 = vadd.f32 1.0, %v1590_v5 }
0x10cb   :  { %v1274_v25 = vsub.f32 1.0, %v1273_v36  ;;  %v1614_v36 = vld [vmem:[#allocation5] sm:$0xff] }
0x10cc   :  { %1591 = vrcp.f32 %v1185_v7  ;;  %v1197_v34 = vand.u32 2147483648, %v1185_v7  ;;  %vm1191_vm2 = vweird.f32 %v1185_v7  ;;  %v1195_v43 = vand.u32 2147483647, %v1185_v7 }
0x10cd   :  { %v1275_v26 = vmul.f32 %v1588_v24, %v1274_v25 }
0x10ce   :  { %v1198_v58 = vor.u32 1.1754944e-38, %v1197_v34  ;;  %vm1196_vm4 = vcmp.eq.f32.partialorder %v1195_v43, 8.507059e+37 }
0x10cf   :  { %v1276_v35 = vadd.f32 %v1588_v24, %v1275_v26 }
0x10d1   :  { %v1280_v2 = vsel %vm1279_vm14, %v1588_v24, %v1276_v35  ;;  %v1613_v24 = vld [vmem:[#allocation5 + $0x8] sm:$0xff] }
0x10d2   :  { %v1285_v45 = vsel %vm1282_vm15, %v1284_v40, %v1280_v2  ;;  %v1592_v10 = vpop.eup %1591  ;;  %v1615_v2 = vld [vmem:[%s2201_s7] ss:$0 sm:$0xff] }
0x10d3   :  { %v1187_v28 = vmul.f32 %v1592_v10, %v1185_v7  ;;  %vm1192_vm1 = vweird.f32 %v1592_v10  ;;  %v1288_v48 = vmul.f32 %v1285_v45, %v2139_v4 }
0x10d4   :  { %vm1193_vm3 = vmor %vm1191_vm2, %vm1192_vm1 }
0x10d5   :  { %v1188_v29 = vsub.f32 1.0, %v1187_v28 }
0x10d7   :  { %v1189_v31 = vmul.f32 %v1592_v10, %v1188_v29 }
0x10d9   :  { %v1190_v32 = vadd.f32 %v1592_v10, %v1189_v31 }
0x10db   :  { %v1194_v44 = vsel %vm1193_vm3, %v1592_v10, %v1190_v32 }
0x10dc   :  { %v1199_v51 = vsel %vm1196_vm4, %v1198_v58, %v1194_v44 }
0x10dd   :  { %v1202_v56 = vmul.f32 %v1199_v51, %v2144_v9 }
0x10ec   :  { %v1291_v42 = vpop.permute.xlu0 %1290 }
0x10ed   :  { %v1293_v3 = vmul.f32 %v1291_v42, %v1285_v45 }
0x10ef   :  { %1295 = vrot.lane.b32.xlu2 %v1293_v3, %s1700_s27 }
0x1119   :  { %v1205_v46 = vpop.permute.xlu2 %1204 }
0x111a   :  { %v1207_v52 = vmul.f32 %v1205_v46, %v1199_v51 }
0x111c   :  { %1209 = vrot.lane.b32.xlu1 %v1207_v52, %s1700_s27 }
0x1149   :  { %v1296_v53 = vpop.permute.xlu2 %1295 }
0x114a   :  { %v1298_v54 = vadd.f32 %v1296_v53, %v1288_v48 }
0x114c   :  { %1593 = vtanh.f32 %v1298_v54 }
0x1152   :  { %v1594_v55 = vpop.eup %1593 }
0x1153   :  { %1301 = vrot.lane.b32.xlu1 %v1594_v55, %s1699_s26 }
0x118e   :  { %v1210_v59 = vpop.permute.xlu1 %1209 }
0x118f   :  { %v1212_v60 = vadd.f32 %v1210_v59, %v1202_v56 }
0x1191   :  { %1595 = vtanh.f32 %v1212_v60 }
0x1197   :  { %v1596_v61 = vpop.eup %1595 }
0x1198   :  { %1215 = vrot.lane.b32.xlu0 %v1596_v61, %s1699_s26 }
0x11c5   :  { %v1302_v63 = vpop.permute.xlu1 %1301 }
0x11c6   :  { %v1304_v0 = vmul.f32 %v1302_v63, %v1285_v45 }
0x11c8   :  { %1306 = vrot.lane.b32.xlu2 %v1304_v0, %s1700_s27 }
0x120a   :  { %v1216_v38 = vpop.permute.xlu0 %1215 }
0x120b   :  { %v1218_v1 = vmul.f32 %v1216_v38, %v1199_v51 }
0x120d   :  { %1309 = vrot.lane.b32.xlu0 %v1218_v1, %s1699_s26 }
0x1222   :  { %v1307_v4 = vpop.permute.xlu2 %1306 }
0x127f   :  { %v1310_v30 = vpop.permute.xlu0 %1309 }
0x1280   :  { %v1312_v6 = vsel %vm86_vm0, %v1307_v4, %v1310_v30 }
0x1281   :  { %1463 = vmatmul.msk.f32.vlgmr.msra.gmra.mxu0 %vm234_vm5, %v1312_v6 }
0x12fe   :  { %v1333_v8 = vpop.f32.mrf.mxu0 }
0x12ff   :  { %v1334_v9 = vadd.f32 %v2132_v37, %v1333_v8 }
0x1301   :  { %1597 = vtanh.f32 %v1334_v9  ;;  %v1464_v14 = vmul.f32 -1.442695, %v1334_v9 }
0x1303   :  { %1599 = vpow2.f32 %v1464_v14 }
0x1307   :  { %v1598_v12 = vpop.eup %1597 }
0x1308   :  { %1358 = vrot.lane.b32.xlu1 %v1598_v12, %s1699_s26 }
0x1309   :  { %v1600_v13 = vpop.eup %1599 }
0x130a   :  { %v1339_v57 = vadd.f32 1.0, %v1600_v13 }
0x130c   :  { %1601 = vrcp.f32 %v1339_v57  ;;  %v1351_v19 = vand.u32 2147483648, %v1339_v57  ;;  %vm1345_vm6 = vweird.f32 %v1339_v57  ;;  %v1349_v37 = vand.u32 2147483647, %v1339_v57 }
0x130e   :  { %v1352_v15 = vor.u32 1.1754944e-38, %v1351_v19  ;;  %vm1350_vm8 = vcmp.eq.f32.partialorder %v1349_v37, 8.507059e+37 }
0x1310   :  { %912 = vrot.lane.b32.xlu1 %v2118_v22, %s1700_s27 }
0x1312   :  { %v1602_v62 = vpop.eup %1601 }
0x1313   :  { %v1341_v18 = vmul.f32 %v1602_v62, %v1339_v57  ;;  %vm1346_vm5 = vweird.f32 %v1602_v62 }
0x1314   :  { %vm1347_vm7 = vmor %vm1345_vm6, %vm1346_vm5 }
0x1315   :  { %v1342_v20 = vsub.f32 1.0, %v1341_v18 }
0x1317   :  { %v1343_v16 = vmul.f32 %v1602_v62, %v1342_v20 }
0x1319   :  { %v1344_v11 = vadd.f32 %v1602_v62, %v1343_v16 }
0x131b   :  { %v1348_v21 = vsel %vm1347_vm7, %v1602_v62, %v1344_v11 }
0x131c   :  { %v1353_v22 = vsel %vm1350_vm8, %v1352_v15, %v1348_v21 }
0x131d   :  { %v1356_v25 = vmul.f32 %v1353_v22, %v1212_v60 }
0x137a   :  { %v1359_v23 = vpop.permute.xlu1 %1358 }
0x137b   :  { %v1361_v47 = vmul.f32 %v1359_v23, %v1353_v22 }
0x137d   :  { %1363 = vrot.lane.b32.xlu2 %v1361_v47, %s1700_s27 }
0x1382   :  { %v913_v33 = vpop.permute.xlu1 %912 }
0x1383   :  { %1450 = vmatmul.msk.f32.vlgmr.msrb.gmra.mxu1 %vm86_vm0, %v913_v33 }
0x1384   :  { %1236 = vmatpush.msrb.mxu1 %v1611_v49 }
0x1385   :  { %1066 = vrot.lane.b32.xlu2 %v2149_v17, %s1700_s27 }
0x1386   :  { %1237 = vmatpush.msrb.mxu1 %v1612_v50 }
0x1388   :  { %1238 = vmatpush.msrb.mxu1 %v1613_v24 }
0x138a   :  { %1239 = vmatpush.msrb.mxu1 %v1614_v36 }
0x13d7   :  { %v1364_v26 = vpop.permute.xlu2 %1363 }
0x13d8   :  { %v1366_v35 = vadd.f32 %v1364_v26, %v1356_v25 }
0x13da   :  { %1603 = vtanh.f32 %v1366_v35 }
0x13df   :  { %v1067_v27 = vpop.permute.xlu2 %1066 }
0x13e0   :  { %v1604_v39 = vpop.eup %1603  ;;  %1455 = vmatmul.msk.f32.vlgmr.msra.gmra.mxu1 %vm86_vm0, %v1067_v27 }
0x13e1   :  { %1369 = vrot.lane.b32.xlu0 %v1604_v39, %s1699_s26  ;;  %1390 = vmatpush.msra.mxu1 %v1611_v49  ;;  %s1701_s26 = smov [#allocation7]  }
0x13e2   :  { %s1403_s7 = sshll.u32 %s1701_s26, 4  ;;  %s1404_s7 = int_to_ptr.vmem [resolvable:$true] %s1403_s7 }
0x13e3   :  { %1391 = vmatpush.msra.mxu1 %v1612_v50 }
0x13e5   :  { %1392 = vmatpush.msra.mxu1 %v1613_v24 }
0x13e7   :  { %1393 = vmatpush.msra.mxu1 %v1614_v36 }
0x13e9   :  { %1220 = vrot.lane.b32.xlu0 %v1218_v1, %s1700_s27 }
0x1400   :  { %v933_v17 = vpop.f32.mrf.mxu1 }
0x1401   :  { %v934_v40 = vadd.f32 %v1615_v2, %v933_v17 }
0x1403   :  { %936 = vst [vmem:[#allocation7 + $0x20] sm:$0xff] %v934_v40 }
0x1453   :  { %v1370_v41 = vpop.permute.xlu0 %1369 }
0x1454   :  { %v1372_v42 = vmul.f32 %v1370_v41, %v1353_v22 }
0x1456   :  { %1374 = vrot.lane.b32.xlu1 %v1372_v42, %s1700_s27 }
0x145b   :  { %v1221_v45 = vpop.permute.xlu0 %1220 }
0x145c   :  { %1460 = vmatmul.msk.f32.vlgmr.msrb.gmra.mxu1 %vm86_vm0, %v1221_v45 }
0x145d   :  { %v1087_v3 = vpop.f32.mrf.mxu1 }
0x145e   :  { %v1088_v5 = vadd.f32 %v1615_v2, %v1087_v3 }
0x1460   :  { %1090 = vst [vmem:[#allocation7 + $0x28] sm:$0xff] %v1088_v5 }
0x14c8   :  { %v1375_v7 = vpop.permute.xlu1 %1374 }
0x14c9   :  { %1465 = vmatmul.msk.f32.vlgmr.msra.gmra.mxu1 %vm86_vm0, %v1375_v7 }
0x14d9   :  { %v1241_v10 = vpop.f32.mrf.mxu1 }
0x14da   :  { %v1242_v28 = vadd.f32 %v1615_v2, %v1241_v10 }
0x14dc   :  { %1244 = vst [vmem:[#allocation7 + $0x30] sm:$0xff] %v1242_v28 }
0x1546   :  { %v1395_v29 = vpop.f32.mrf.mxu1 }
0x1547   :  { %v1396_v31 = vadd.f32 %v1615_v2, %v1395_v29 }
0x1549   :  { %1398 = vst [vmem:[#allocation7 + $0x38] sm:$0xff] %v1396_v31 }
0x154a   :  { %1411 = dma.vmem_to_hbm [thread:$0]  %s1404_s7, 1024, %s1406_s23, [#allocation4], %s1695_s13, %s1695_s13, %s1696_s14  }
0x154b   :  { %1692 = dma.done.wait [#allocation4], 1024  }
0x154c   :  { %1693 = vsyncadd [#allocation4], 4294966272 }
0x154d   :  { %1416 = vsyncpa [#allocation3], 1 }
0x154e   :  { %1417 = vsyncpa [#allocation6], 1 }
0x154f   :  { %1418 = vsyncpa [#allocation4], 1 }

</bundles_post_ra>
